<compile_context>
chip_gen: v7x
topology: tpu7x:2x2x1
jax: 0.10.0
libtpu: 0.0.40
codegen_flags: <defaults>
</compile_context>

<pallas_src>
import numpy as np

import jax
import jax.numpy as jnp
from jax.experimental import pallas as pl
from jax.experimental.pallas import tpu as pltpu


def _basic_block_kernel(xpad_ref, xres_ref, w1_ref, t1_ref, w2_ref, t2_ref,
                        out_ref, ypad_ref):
    # xpad_ref : (1, D+2, H+2, (W+2)*C) bf16  zero-padded input, lane-dense
    # xres_ref : (1, D,   H,   W*C)     f32   residual
    # w*_ref   : (9, (W+2)*C, W*C)      bf16  banded conv weights (bias/BN folded)
    # t*_ref   : (1, W*C)               f32   folded shift (bn_shift + bias*scale)
    # out_ref  : (1, D, H, W*C)         f32
    # ypad_ref : VMEM (D+2, H+2, (W+2)*C) bf16 scratch (padded conv1 output)
    _, Dp2, Hp2, Lin = xpad_ref.shape
    Lout = out_ref.shape[-1]                 # W * C
    D, H = Dp2 - 2, Hp2 - 2
    C = (Lin - Lout) // 2
    MH = D * H
    bdt = ypad_ref.dtype

    # Zero only the halo of the scratch; the interior is fully overwritten
    # below.  Done every step (cheap) so it is correct even when the grid is
    # sharded across TensorCores ("parallel" semantics).
    ypad_ref[0:1, :, :] = jnp.zeros((1, Hp2, Lin), bdt)
    ypad_ref[Dp2 - 1:Dp2, :, :] = jnp.zeros((1, Hp2, Lin), bdt)
    ypad_ref[1:1 + D, 0:1, :] = jnp.zeros((D, 1, Lin), bdt)
    ypad_ref[1:1 + D, Hp2 - 1:Hp2, :] = jnp.zeros((D, 1, Lin), bdt)
    ypad_ref[1:1 + D, 1:1 + H, 0:C] = jnp.zeros((D, H, C), bdt)
    ypad_ref[1:1 + D, 1:1 + H, C + Lout:Lin] = jnp.zeros((D, H, C), bdt)

    # ---- conv1 (+ folded bias / BN scale): 9 banded MXU matmuls ----
    xp = xpad_ref[0]                                       # (D+2, H+2, Lin)
    acc = jnp.zeros((MH, Lout), jnp.float32)
    for kd in range(3):
        for kh in range(3):
            slab = xp[kd:kd + D, kh:kh + H, :].reshape(MH, Lin)
            acc += jnp.dot(slab, w1_ref[kd * 3 + kh],
                           preferred_element_type=jnp.float32)
    out1 = jnp.maximum(acc + t1_ref[...], 0.0)             # shift + relu

    # write conv1 output into the interior of the padded scratch (bf16)
    ypad_ref[1:1 + D, 1:1 + H, C:C + Lout] = (
        out1.reshape(D, H, Lout).astype(bdt))

    # ---- conv2 (+ folded bias / BN scale) ----
    yp = ypad_ref[...]
    acc2 = jnp.zeros((MH, Lout), jnp.float32)
    for kd in range(3):
        for kh in range(3):
            slab = yp[kd:kd + D, kh:kh + H, :].reshape(MH, Lin)
            acc2 += jnp.dot(slab, w2_ref[kd * 3 + kh],
                            preferred_element_type=jnp.float32)
    out2 = acc2 + t2_ref[...] + xres_ref[0].reshape(MH, Lout)   # residual add
    out_ref[0] = jnp.maximum(out2, 0.0).reshape(D, H, Lout)     # final relu


@jax.jit
def basic_block_pallas(x_ncdhw, w1_banded, t1_flat, w2_banded, t2_flat):
    # x_ncdhw: (N, C, D, H, W) like the PyTorch module.
    N, C, D, H, W = x_ncdhw.shape
    Lin, Lout = (W + 2) * C, W * C

    x_ndhwc = jnp.transpose(x_ncdhw, (0, 2, 3, 4, 1)).astype(jnp.float32)
    xres = x_ndhwc.reshape(N, D, H, Lout)                         # f32 residual
    xpad = jnp.pad(x_ndhwc, ((0, 0), (1, 1), (1, 1), (1, 1), (0, 0)))
    xpad = xpad.reshape(N, D + 2, H + 2, Lin).astype(jnp.bfloat16)

    out_flat = pl.pallas_call(
        _basic_block_kernel,
        out_shape=jax.ShapeDtypeStruct((N, D, H, Lout), jnp.float32),
        grid=(N,),
        in_specs=[
            pl.BlockSpec((1, D + 2, H + 2, Lin), lambda n: (n, 0, 0, 0)),  # xpad
            pl.BlockSpec((1, D, H, Lout), lambda n: (n, 0, 0, 0)),         # residual
            pl.BlockSpec((9, Lin, Lout), lambda n: (0, 0, 0)),             # w1 (resident)
            pl.BlockSpec((1, Lout), lambda n: (0, 0)),                     # t1
            pl.BlockSpec((9, Lin, Lout), lambda n: (0, 0, 0)),             # w2 (resident)
            pl.BlockSpec((1, Lout), lambda n: (0, 0)),                     # t2
        ],
        out_specs=pl.BlockSpec((1, D, H, Lout), lambda n: (n, 0, 0, 0)),
        scratch_shapes=[pltpu.VMEM((D + 2, H + 2, Lin), jnp.bfloat16)],
        compiler_params=pltpu.CompilerParams(
            dimension_semantics=("parallel",)),
    )(xpad, xres, w1_banded, t1_flat, w2_banded, t2_flat)

    out = out_flat.reshape(N, D, H, W, C)
    return jnp.transpose(out, (0, 4, 1, 2, 3))                    # back to NCDHW


# --------------------- host-side parameter folding --------------------- #
def fold_and_pack(w_torch, bias, scale, shift, W, C):
    """Fold conv bias + BN scale/shift, build the banded lane-dense weight.

    y = BN(conv(x, w) + bias) = conv(x, w * scale[co]) + (shift + bias*scale)
    The banded matrix B[kd*3+kh] maps a flattened padded row ((W+2)*C lanes)
    directly to a flattened output row (W*C lanes), encoding the kw shift.
    """
    w = np.asarray(w_torch, np.float32)               # (Cout, Cin, 3, 3, 3)
    s = np.asarray(scale, np.float32)
    wf = w * s[:, None, None, None, None]
    B = np.zeros((9, (W + 2) * C, W * C), np.float32)
    for kd in range(3):
        for kh in range(3):
            for kw in range(3):
                blk = wf[:, :, kd, kh, kw].T          # (Cin, Cout)
                for wo in range(W):
                    B[kd * 3 + kh,
                      (wo + kw) * C:(wo + kw + 1) * C,
                      wo * C:(wo + 1) * C] = blk
    t = np.asarray(shift, np.float32) + np.asarray(bias, np.float32) * s
    t_flat = np.tile(t, W).reshape(1, W * C)
    return jnp.asarray(B, jnp.bfloat16), jnp.asarray(t_flat, jnp.float32)


# ------------------------- pure-JAX reference ------------------------- #
def _conv3d_ref(x_ndhwc, w_dhwio, b):
    y = jax.lax.conv_general_dilated(
        x_ndhwc, w_dhwio, window_strides=(1, 1, 1),
        padding=[(1, 1), (1, 1), (1, 1)],
        dimension_numbers=("NDHWC", "DHWIO", "NDHWC"),
        precision=jax.lax.Precision.HIGHEST)
    return y + b


def basic_block_ref(x_ncdhw, w1_t, b1, s1, t1, w2_t, b2, s2, t2):
    x = jnp.transpose(x_ncdhw, (0, 2, 3, 4, 1)).astype(jnp.float32)
    w1_dhwio = jnp.transpose(w1_t, (2, 3, 4, 1, 0))   # torch (O,I,d,h,w) -> DHWIO
    w2_dhwio = jnp.transpose(w2_t, (2, 3, 4, 1, 0))
    out = _conv3d_ref(x, w1_dhwio, b1)
    out = jnp.maximum(out * s1 + t1, 0.0)
    out = _conv3d_ref(out, w2_dhwio, b2)
    out = out * s2 + t2
    out = jnp.maximum(out + x, 0.0)
    return jnp.transpose(out, (0, 4, 1, 2, 3))


if __name__ == "__main__":
    N, C, D, H, W = 2, 4, 8, 8, 8
    eps = 1e-5

    key = jax.random.PRNGKey(0)
    keys = jax.random.split(key, 12)

    x = jax.random.normal(keys[0], (N, C, D, H, W), jnp.float32)

    # conv weights in PyTorch layout (C_out, C_in, kD, kH, kW)
    w1_t = jax.random.normal(keys[1], (C, C, 3, 3, 3), jnp.float32) * 0.1
    b1 = jax.random.normal(keys[2], (C,), jnp.float32) * 0.1
    w2_t = jax.random.normal(keys[3], (C, C, 3, 3, 3), jnp.float32) * 0.1
    b2 = jax.random.normal(keys[4], (C,), jnp.float32) * 0.1

    # BatchNorm3d parameters / running stats (inference mode, folded)
    g1 = 1.0 + 0.1 * jax.random.normal(keys[5], (C,), jnp.float32)
    be1 = 0.1 * jax.random.normal(keys[6], (C,), jnp.float32)
    m1 = 0.1 * jax.random.normal(keys[7], (C,), jnp.float32)
    v1 = 0.5 + jnp.abs(jax.random.normal(keys[8], (C,), jnp.float32)) * 0.1
    g2 = 1.0 + 0.1 * jax.random.normal(keys[9], (C,), jnp.float32)
    be2 = 0.1 * jax.random.normal(keys[10], (C,), jnp.float32)
    m2 = 0.1 * jax.random.normal(keys[11], (C,), jnp.float32)
    v2 = 0.5 + jnp.abs(jax.random.normal(keys[0], (C,), jnp.float32)) * 0.1

    s1 = g1 / jnp.sqrt(v1 + eps)
    t1 = be1 - m1 * s1
    s2 = g2 / jnp.sqrt(v2 + eps)
    t2 = be2 - m2 * s2

    # fold bias/BN into banded bf16 weights + per-lane shift (host side)
    w1_banded, t1_flat = fold_and_pack(w1_t, b1, s1, t1, W, C)
    w2_banded, t2_flat = fold_and_pack(w2_t, b2, s2, t2, W, C)

    out = basic_block_pallas(x, w1_banded, t1_flat, w2_banded, t2_flat)
    out = jax.block_until_ready(out)

    ref = basic_block_ref(x, w1_t, b1, s1, t1, w2_t, b2, s2, t2)
    ref = jax.block_until_ready(ref)

    assert out.shape == (N, C, D, H, W)
    # bf16 activations/weights with f32 accumulation vs pure-f32 reference.
    max_err = float(jnp.max(jnp.abs(out - ref)))
    assert jnp.allclose(out, ref, rtol=3e-2, atol=3e-2), max_err

    print("KERNEL_OK")
</pallas_src>

<mosaic_0001>
module attributes {stable_mosaic.version = 11 : i64} {
  func.func @_basic_block_kernel(%arg0: i32, %arg1: memref<1x10x10x40xbf16, #tpu.memory_space<vmem>>, %arg2: memref<1x8x8x32xf32, #tpu.memory_space<vmem>>, %arg3: memref<9x40x32xbf16, #tpu.memory_space<vmem>>, %arg4: memref<1x32xf32, #tpu.memory_space<vmem>>, %arg5: memref<9x40x32xbf16, #tpu.memory_space<vmem>>, %arg6: memref<1x32xf32, #tpu.memory_space<vmem>>, %arg7: memref<1x8x8x32xf32, #tpu.memory_space<vmem>>, %arg8: memref<10x10x40xbf16, #tpu.memory_space<vmem>>) attributes {dimension_semantics = [#tpu.dimension_semantics<parallel>], iteration_bounds = array<i64: 2>, scalar_prefetch = 0 : i64, scratch_operands = 1 : i64, tpu.core_type = #tpu.core_type<tc>, window_params = [{transform_indices = @transform_0, window_bounds = array<i64: 1, 10, 10, 40>}, {transform_indices = @transform_1, window_bounds = array<i64: 1, 8, 8, 32>}, {pipeline_mode = #tpu.pipeline_mode<synchronous>, transform_indices = @transform_2, window_bounds = array<i64: 9, 40, 32>}, {pipeline_mode = #tpu.pipeline_mode<synchronous>, transform_indices = @transform_3, window_bounds = array<i64: 1, 32>}, {pipeline_mode = #tpu.pipeline_mode<synchronous>, transform_indices = @transform_4, window_bounds = array<i64: 9, 40, 32>}, {pipeline_mode = #tpu.pipeline_mode<synchronous>, transform_indices = @transform_5, window_bounds = array<i64: 1, 32>}, {transform_indices = @transform_6, window_bounds = array<i64: 1, 8, 8, 32>}]} {
    %cst = arith.constant 0.000000e+00 : bf16
    %0 = vector.broadcast %cst : bf16 to vector<1x10x40xbf16>
    %c0 = arith.constant 0 : index
    %c0_0 = arith.constant 0 : index
    %c0_1 = arith.constant 0 : index
    %1 = vector.load %arg8[%c0, %c0_0, %c0_1] : memref<10x10x40xbf16, #tpu.memory_space<vmem>>, vector<1x10x40xbf16>
    tpu.vector_store %arg8[%c0, %c0_0, %c0_1], %0 {strides = array<i32>} : memref<10x10x40xbf16, #tpu.memory_space<vmem>>, vector<1x10x40xbf16>,
    %cst_2 = arith.constant 0.000000e+00 : bf16
    %2 = vector.broadcast %cst_2 : bf16 to vector<1x10x40xbf16>
    %c9 = arith.constant 9 : index
    %c0_3 = arith.constant 0 : index
    %c0_4 = arith.constant 0 : index
    %3 = vector.load %arg8[%c9, %c0_3, %c0_4] : memref<10x10x40xbf16, #tpu.memory_space<vmem>>, vector<1x10x40xbf16>
    tpu.vector_store %arg8[%c9, %c0_3, %c0_4], %2 {strides = array<i32>} : memref<10x10x40xbf16, #tpu.memory_space<vmem>>, vector<1x10x40xbf16>,
    %cst_5 = arith.constant 0.000000e+00 : bf16
    %4 = vector.broadcast %cst_5 : bf16 to vector<8x1x40xbf16>
    %c1 = arith.constant 1 : index
    %c0_6 = arith.constant 0 : index
    %c0_7 = arith.constant 0 : index
    %5 = vector.load %arg8[%c1, %c0_6, %c0_7] : memref<10x10x40xbf16, #tpu.memory_space<vmem>>, vector<8x1x40xbf16>
    tpu.vector_store %arg8[%c1, %c0_6, %c0_7], %4 {strides = array<i32>} : memref<10x10x40xbf16, #tpu.memory_space<vmem>>, vector<8x1x40xbf16>,
    %cst_8 = arith.constant 0.000000e+00 : bf16
    %6 = vector.broadcast %cst_8 : bf16 to vector<8x1x40xbf16>
    %c1_9 = arith.constant 1 : index
    %c9_10 = arith.constant 9 : index
    %c0_11 = arith.constant 0 : index
    %7 = vector.load %arg8[%c1_9, %c9_10, %c0_11] : memref<10x10x40xbf16, #tpu.memory_space<vmem>>, vector<8x1x40xbf16>
    tpu.vector_store %arg8[%c1_9, %c9_10, %c0_11], %6 {strides = array<i32>} : memref<10x10x40xbf16, #tpu.memory_space<vmem>>, vector<8x1x40xbf16>,
    %cst_12 = arith.constant 0.000000e+00 : bf16
    %8 = vector.broadcast %cst_12 : bf16 to vector<8x8x4xbf16>
    %c1_13 = arith.constant 1 : index
    %c1_14 = arith.constant 1 : index
    %c0_15 = arith.constant 0 : index
    %9 = vector.load %arg8[%c1_13, %c1_14, %c0_15] : memref<10x10x40xbf16, #tpu.memory_space<vmem>>, vector<8x8x4xbf16>
    tpu.vector_store %arg8[%c1_13, %c1_14, %c0_15], %8 {strides = array<i32>} : memref<10x10x40xbf16, #tpu.memory_space<vmem>>, vector<8x8x4xbf16>,
    %cst_16 = arith.constant 0.000000e+00 : bf16
    %10 = vector.broadcast %cst_16 : bf16 to vector<8x8x4xbf16>
    %c1_17 = arith.constant 1 : index
    %c1_18 = arith.constant 1 : index
    %c36 = arith.constant 36 : index
    %11 = vector.load %arg8[%c1_17, %c1_18, %c36] : memref<10x10x40xbf16, #tpu.memory_space<vmem>>, vector<8x8x4xbf16>
    tpu.vector_store %arg8[%c1_17, %c1_18, %c36], %10 {strides = array<i32>} : memref<10x10x40xbf16, #tpu.memory_space<vmem>>, vector<8x8x4xbf16>,
    %c0_19 = arith.constant 0 : index
    %c0_20 = arith.constant 0 : index
    %c0_21 = arith.constant 0 : index
    %c0_22 = arith.constant 0 : index
    %12 = vector.load %arg1[%c0_19, %c0_20, %c0_21, %c0_22] : memref<1x10x10x40xbf16, #tpu.memory_space<vmem>>, vector<1x10x10x40xbf16>
    %13 = vector.shape_cast %12 : vector<1x10x10x40xbf16> to vector<10x10x40xbf16>
    %cst_23 = arith.constant 0.000000e+00 : f32
    %14 = vector.broadcast %cst_23 : f32 to vector<64x32xf32>
    %15 = vector.extract_strided_slice %13 {offsets = [0, 0, 0], sizes = [8, 8, 40], strides = [1, 1, 1]} : vector<10x10x40xbf16> to vector<8x8x40xbf16>
    %16 = vector.shape_cast %15 : vector<8x8x40xbf16> to vector<64x40xbf16>
    %c0_24 = arith.constant 0 : index
    %c0_25 = arith.constant 0 : index
    %c0_26 = arith.constant 0 : index
    %17 = vector.load %arg3[%c0_24, %c0_25, %c0_26] : memref<9x40x32xbf16, #tpu.memory_space<vmem>>, vector<1x40x32xbf16>
    %18 = vector.shape_cast %17 : vector<1x40x32xbf16> to vector<40x32xbf16>
    %cst_27 = arith.constant dense<0.000000e+00> : vector<64x32xf32>
    %19 = tpu.matmul %16, %18, %cst_27 {dimension_numbers = #tpu.dot_dimension_numbers<[1], [0], [0], [1], [0, 0, 1, 1], [], []>} : vector<64x40xbf16>, vector<40x32xbf16>, vector<64x32xf32> -> vector<64x32xf32>
    %20 = arith.addf %14, %19 : vector<64x32xf32>
    %21 = vector.extract_strided_slice %13 {offsets = [0, 1, 0], sizes = [8, 8, 40], strides = [1, 1, 1]} : vector<10x10x40xbf16> to vector<8x8x40xbf16>
    %22 = vector.shape_cast %21 : vector<8x8x40xbf16> to vector<64x40xbf16>
    %c1_28 = arith.constant 1 : index
    %c0_29 = arith.constant 0 : index
    %c0_30 = arith.constant 0 : index
    %23 = vector.load %arg3[%c1_28, %c0_29, %c0_30] : memref<9x40x32xbf16, #tpu.memory_space<vmem>>, vector<1x40x32xbf16>
    %24 = vector.shape_cast %23 : vector<1x40x32xbf16> to vector<40x32xbf16>
    %cst_31 = arith.constant dense<0.000000e+00> : vector<64x32xf32>
    %25 = tpu.matmul %22, %24, %cst_31 {dimension_numbers = #tpu.dot_dimension_numbers<[1], [0], [0], [1], [0, 0, 1, 1], [], []>} : vector<64x40xbf16>, vector<40x32xbf16>, vector<64x32xf32> -> vector<64x32xf32>
    %26 = arith.addf %20, %25 : vector<64x32xf32>
    %27 = vector.extract_strided_slice %13 {offsets = [0, 2, 0], sizes = [8, 8, 40], strides = [1, 1, 1]} : vector<10x10x40xbf16> to vector<8x8x40xbf16>
    %28 = vector.shape_cast %27 : vector<8x8x40xbf16> to vector<64x40xbf16>
    %c2 = arith.constant 2 : index
    %c0_32 = arith.constant 0 : index
    %c0_33 = arith.constant 0 : index
    %29 = vector.load %arg3[%c2, %c0_32, %c0_33] : memref<9x40x32xbf16, #tpu.memory_space<vmem>>, vector<1x40x32xbf16>
    %30 = vector.shape_cast %29 : vector<1x40x32xbf16> to vector<40x32xbf16>
    %cst_34 = arith.constant dense<0.000000e+00> : vector<64x32xf32>
    %31 = tpu.matmul %28, %30, %cst_34 {dimension_numbers = #tpu.dot_dimension_numbers<[1], [0], [0], [1], [0, 0, 1, 1], [], []>} : vector<64x40xbf16>, vector<40x32xbf16>, vector<64x32xf32> -> vector<64x32xf32>
    %32 = arith.addf %26, %31 : vector<64x32xf32>
    %33 = vector.extract_strided_slice %13 {offsets = [1, 0, 0], sizes = [8, 8, 40], strides = [1, 1, 1]} : vector<10x10x40xbf16> to vector<8x8x40xbf16>
    %34 = vector.shape_cast %33 : vector<8x8x40xbf16> to vector<64x40xbf16>
    %c3 = arith.constant 3 : index
    %c0_35 = arith.constant 0 : index
    %c0_36 = arith.constant 0 : index
    %35 = vector.load %arg3[%c3, %c0_35, %c0_36] : memref<9x40x32xbf16, #tpu.memory_space<vmem>>, vector<1x40x32xbf16>
    %36 = vector.shape_cast %35 : vector<1x40x32xbf16> to vector<40x32xbf16>
    %cst_37 = arith.constant dense<0.000000e+00> : vector<64x32xf32>
    %37 = tpu.matmul %34, %36, %cst_37 {dimension_numbers = #tpu.dot_dimension_numbers<[1], [0], [0], [1], [0, 0, 1, 1], [], []>} : vector<64x40xbf16>, vector<40x32xbf16>, vector<64x32xf32> -> vector<64x32xf32>
    %38 = arith.addf %32, %37 : vector<64x32xf32>
    %39 = vector.extract_strided_slice %13 {offsets = [1, 1, 0], sizes = [8, 8, 40], strides = [1, 1, 1]} : vector<10x10x40xbf16> to vector<8x8x40xbf16>
    %40 = vector.shape_cast %39 : vector<8x8x40xbf16> to vector<64x40xbf16>
    %c4 = arith.constant 4 : index
    %c0_38 = arith.constant 0 : index
    %c0_39 = arith.constant 0 : index
    %41 = vector.load %arg3[%c4, %c0_38, %c0_39] : memref<9x40x32xbf16, #tpu.memory_space<vmem>>, vector<1x40x32xbf16>
    %42 = vector.shape_cast %41 : vector<1x40x32xbf16> to vector<40x32xbf16>
    %cst_40 = arith.constant dense<0.000000e+00> : vector<64x32xf32>
    %43 = tpu.matmul %40, %42, %cst_40 {dimension_numbers = #tpu.dot_dimension_numbers<[1], [0], [0], [1], [0, 0, 1, 1], [], []>} : vector<64x40xbf16>, vector<40x32xbf16>, vector<64x32xf32> -> vector<64x32xf32>
    %44 = arith.addf %38, %43 : vector<64x32xf32>
    %45 = vector.extract_strided_slice %13 {offsets = [1, 2, 0], sizes = [8, 8, 40], strides = [1, 1, 1]} : vector<10x10x40xbf16> to vector<8x8x40xbf16>
    %46 = vector.shape_cast %45 : vector<8x8x40xbf16> to vector<64x40xbf16>
    %c5 = arith.constant 5 : index
    %c0_41 = arith.constant 0 : index
    %c0_42 = arith.constant 0 : index
    %47 = vector.load %arg3[%c5, %c0_41, %c0_42] : memref<9x40x32xbf16, #tpu.memory_space<vmem>>, vector<1x40x32xbf16>
    %48 = vector.shape_cast %47 : vector<1x40x32xbf16> to vector<40x32xbf16>
    %cst_43 = arith.constant dense<0.000000e+00> : vector<64x32xf32>
    %49 = tpu.matmul %46, %48, %cst_43 {dimension_numbers = #tpu.dot_dimension_numbers<[1], [0], [0], [1], [0, 0, 1, 1], [], []>} : vector<64x40xbf16>, vector<40x32xbf16>, vector<64x32xf32> -> vector<64x32xf32>
    %50 = arith.addf %44, %49 : vector<64x32xf32>
    %51 = vector.extract_strided_slice %13 {offsets = [2, 0, 0], sizes = [8, 8, 40], strides = [1, 1, 1]} : vector<10x10x40xbf16> to vector<8x8x40xbf16>
    %52 = vector.shape_cast %51 : vector<8x8x40xbf16> to vector<64x40xbf16>
    %c6 = arith.constant 6 : index
    %c0_44 = arith.constant 0 : index
    %c0_45 = arith.constant 0 : index
    %53 = vector.load %arg3[%c6, %c0_44, %c0_45] : memref<9x40x32xbf16, #tpu.memory_space<vmem>>, vector<1x40x32xbf16>
    %54 = vector.shape_cast %53 : vector<1x40x32xbf16> to vector<40x32xbf16>
    %cst_46 = arith.constant dense<0.000000e+00> : vector<64x32xf32>
    %55 = tpu.matmul %52, %54, %cst_46 {dimension_numbers = #tpu.dot_dimension_numbers<[1], [0], [0], [1], [0, 0, 1, 1], [], []>} : vector<64x40xbf16>, vector<40x32xbf16>, vector<64x32xf32> -> vector<64x32xf32>
    %56 = arith.addf %50, %55 : vector<64x32xf32>
    %57 = vector.extract_strided_slice %13 {offsets = [2, 1, 0], sizes = [8, 8, 40], strides = [1, 1, 1]} : vector<10x10x40xbf16> to vector<8x8x40xbf16>
    %58 = vector.shape_cast %57 : vector<8x8x40xbf16> to vector<64x40xbf16>
    %c7 = arith.constant 7 : index
    %c0_47 = arith.constant 0 : index
    %c0_48 = arith.constant 0 : index
    %59 = vector.load %arg3[%c7, %c0_47, %c0_48] : memref<9x40x32xbf16, #tpu.memory_space<vmem>>, vector<1x40x32xbf16>
    %60 = vector.shape_cast %59 : vector<1x40x32xbf16> to vector<40x32xbf16>
    %cst_49 = arith.constant dense<0.000000e+00> : vector<64x32xf32>
    %61 = tpu.matmul %58, %60, %cst_49 {dimension_numbers = #tpu.dot_dimension_numbers<[1], [0], [0], [1], [0, 0, 1, 1], [], []>} : vector<64x40xbf16>, vector<40x32xbf16>, vector<64x32xf32> -> vector<64x32xf32>
    %62 = arith.addf %56, %61 : vector<64x32xf32>
    %63 = vector.extract_strided_slice %13 {offsets = [2, 2, 0], sizes = [8, 8, 40], strides = [1, 1, 1]} : vector<10x10x40xbf16> to vector<8x8x40xbf16>
    %64 = vector.shape_cast %63 : vector<8x8x40xbf16> to vector<64x40xbf16>
    %c8 = arith.constant 8 : index
    %c0_50 = arith.constant 0 : index
    %c0_51 = arith.constant 0 : index
    %65 = vector.load %arg3[%c8, %c0_50, %c0_51] : memref<9x40x32xbf16, #tpu.memory_space<vmem>>, vector<1x40x32xbf16>
    %66 = vector.shape_cast %65 : vector<1x40x32xbf16> to vector<40x32xbf16>
    %cst_52 = arith.constant dense<0.000000e+00> : vector<64x32xf32>
    %67 = tpu.matmul %64, %66, %cst_52 {dimension_numbers = #tpu.dot_dimension_numbers<[1], [0], [0], [1], [0, 0, 1, 1], [], []>} : vector<64x40xbf16>, vector<40x32xbf16>, vector<64x32xf32> -> vector<64x32xf32>
    %68 = arith.addf %62, %67 : vector<64x32xf32>
    %c0_53 = arith.constant 0 : index
    %c0_54 = arith.constant 0 : index
    %69 = vector.load %arg4[%c0_53, %c0_54] : memref<1x32xf32, #tpu.memory_space<vmem>>, vector<1x32xf32>
    %70 = vector.broadcast %69 : vector<1x32xf32> to vector<64x32xf32>
    %71 = arith.addf %68, %70 : vector<64x32xf32>
    %cst_55 = arith.constant 0.000000e+00 : f32
    %72 = vector.broadcast %cst_55 : f32 to vector<64x32xf32>
    %73 = arith.maximumf %71, %72 : vector<64x32xf32>
    %74 = vector.shape_cast %73 : vector<64x32xf32> to vector<8x8x32xf32>
    %75 = arith.truncf %74 : vector<8x8x32xf32> to vector<8x8x32xbf16>
    %c1_56 = arith.constant 1 : index
    %c1_57 = arith.constant 1 : index
    %c4_58 = arith.constant 4 : index
    %76 = vector.load %arg8[%c1_56, %c1_57, %c4_58] : memref<10x10x40xbf16, #tpu.memory_space<vmem>>, vector<8x8x32xbf16>
    tpu.vector_store %arg8[%c1_56, %c1_57, %c4_58], %75 {strides = array<i32>} : memref<10x10x40xbf16, #tpu.memory_space<vmem>>, vector<8x8x32xbf16>,
    %c0_59 = arith.constant 0 : index
    %c0_60 = arith.constant 0 : index
    %c0_61 = arith.constant 0 : index
    %77 = vector.load %arg8[%c0_59, %c0_60, %c0_61] : memref<10x10x40xbf16, #tpu.memory_space<vmem>>, vector<10x10x40xbf16>
    %cst_62 = arith.constant 0.000000e+00 : f32
    %78 = vector.broadcast %cst_62 : f32 to vector<64x32xf32>
    %79 = vector.extract_strided_slice %77 {offsets = [0, 0, 0], sizes = [8, 8, 40], strides = [1, 1, 1]} : vector<10x10x40xbf16> to vector<8x8x40xbf16>
    %80 = vector.shape_cast %79 : vector<8x8x40xbf16> to vector<64x40xbf16>
    %c0_63 = arith.constant 0 : index
    %c0_64 = arith.constant 0 : index
    %c0_65 = arith.constant 0 : index
    %81 = vector.load %arg5[%c0_63, %c0_64, %c0_65] : memref<9x40x32xbf16, #tpu.memory_space<vmem>>, vector<1x40x32xbf16>
    %82 = vector.shape_cast %81 : vector<1x40x32xbf16> to vector<40x32xbf16>
    %cst_66 = arith.constant dense<0.000000e+00> : vector<64x32xf32>
    %83 = tpu.matmul %80, %82, %cst_66 {dimension_numbers = #tpu.dot_dimension_numbers<[1], [0], [0], [1], [0, 0, 1, 1], [], []>} : vector<64x40xbf16>, vector<40x32xbf16>, vector<64x32xf32> -> vector<64x32xf32>
    %84 = arith.addf %78, %83 : vector<64x32xf32>
    %85 = vector.extract_strided_slice %77 {offsets = [0, 1, 0], sizes = [8, 8, 40], strides = [1, 1, 1]} : vector<10x10x40xbf16> to vector<8x8x40xbf16>
    %86 = vector.shape_cast %85 : vector<8x8x40xbf16> to vector<64x40xbf16>
    %c1_67 = arith.constant 1 : index
    %c0_68 = arith.constant 0 : index
    %c0_69 = arith.constant 0 : index
    %87 = vector.load %arg5[%c1_67, %c0_68, %c0_69] : memref<9x40x32xbf16, #tpu.memory_space<vmem>>, vector<1x40x32xbf16>
    %88 = vector.shape_cast %87 : vector<1x40x32xbf16> to vector<40x32xbf16>
    %cst_70 = arith.constant dense<0.000000e+00> : vector<64x32xf32>
    %89 = tpu.matmul %86, %88, %cst_70 {dimension_numbers = #tpu.dot_dimension_numbers<[1], [0], [0], [1], [0, 0, 1, 1], [], []>} : vector<64x40xbf16>, vector<40x32xbf16>, vector<64x32xf32> -> vector<64x32xf32>
    %90 = arith.addf %84, %89 : vector<64x32xf32>
    %91 = vector.extract_strided_slice %77 {offsets = [0, 2, 0], sizes = [8, 8, 40], strides = [1, 1, 1]} : vector<10x10x40xbf16> to vector<8x8x40xbf16>
    %92 = vector.shape_cast %91 : vector<8x8x40xbf16> to vector<64x40xbf16>
    %c2_71 = arith.constant 2 : index
    %c0_72 = arith.constant 0 : index
    %c0_73 = arith.constant 0 : index
    %93 = vector.load %arg5[%c2_71, %c0_72, %c0_73] : memref<9x40x32xbf16, #tpu.memory_space<vmem>>, vector<1x40x32xbf16>
    %94 = vector.shape_cast %93 : vector<1x40x32xbf16> to vector<40x32xbf16>
    %cst_74 = arith.constant dense<0.000000e+00> : vector<64x32xf32>
    %95 = tpu.matmul %92, %94, %cst_74 {dimension_numbers = #tpu.dot_dimension_numbers<[1], [0], [0], [1], [0, 0, 1, 1], [], []>} : vector<64x40xbf16>, vector<40x32xbf16>, vector<64x32xf32> -> vector<64x32xf32>
    %96 = arith.addf %90, %95 : vector<64x32xf32>
    %97 = vector.extract_strided_slice %77 {offsets = [1, 0, 0], sizes = [8, 8, 40], strides = [1, 1, 1]} : vector<10x10x40xbf16> to vector<8x8x40xbf16>
    %98 = vector.shape_cast %97 : vector<8x8x40xbf16> to vector<64x40xbf16>
    %c3_75 = arith.constant 3 : index
    %c0_76 = arith.constant 0 : index
    %c0_77 = arith.constant 0 : index
    %99 = vector.load %arg5[%c3_75, %c0_76, %c0_77] : memref<9x40x32xbf16, #tpu.memory_space<vmem>>, vector<1x40x32xbf16>
    %100 = vector.shape_cast %99 : vector<1x40x32xbf16> to vector<40x32xbf16>
    %cst_78 = arith.constant dense<0.000000e+00> : vector<64x32xf32>
    %101 = tpu.matmul %98, %100, %cst_78 {dimension_numbers = #tpu.dot_dimension_numbers<[1], [0], [0], [1], [0, 0, 1, 1], [], []>} : vector<64x40xbf16>, vector<40x32xbf16>, vector<64x32xf32> -> vector<64x32xf32>
    %102 = arith.addf %96, %101 : vector<64x32xf32>
    %103 = vector.extract_strided_slice %77 {offsets = [1, 1, 0], sizes = [8, 8, 40], strides = [1, 1, 1]} : vector<10x10x40xbf16> to vector<8x8x40xbf16>
    %104 = vector.shape_cast %103 : vector<8x8x40xbf16> to vector<64x40xbf16>
    %c4_79 = arith.constant 4 : index
    %c0_80 = arith.constant 0 : index
    %c0_81 = arith.constant 0 : index
    %105 = vector.load %arg5[%c4_79, %c0_80, %c0_81] : memref<9x40x32xbf16, #tpu.memory_space<vmem>>, vector<1x40x32xbf16>
    %106 = vector.shape_cast %105 : vector<1x40x32xbf16> to vector<40x32xbf16>
    %cst_82 = arith.constant dense<0.000000e+00> : vector<64x32xf32>
    %107 = tpu.matmul %104, %106, %cst_82 {dimension_numbers = #tpu.dot_dimension_numbers<[1], [0], [0], [1], [0, 0, 1, 1], [], []>} : vector<64x40xbf16>, vector<40x32xbf16>, vector<64x32xf32> -> vector<64x32xf32>
    %108 = arith.addf %102, %107 : vector<64x32xf32>
    %109 = vector.extract_strided_slice %77 {offsets = [1, 2, 0], sizes = [8, 8, 40], strides = [1, 1, 1]} : vector<10x10x40xbf16> to vector<8x8x40xbf16>
    %110 = vector.shape_cast %109 : vector<8x8x40xbf16> to vector<64x40xbf16>
    %c5_83 = arith.constant 5 : index
    %c0_84 = arith.constant 0 : index
    %c0_85 = arith.constant 0 : index
    %111 = vector.load %arg5[%c5_83, %c0_84, %c0_85] : memref<9x40x32xbf16, #tpu.memory_space<vmem>>, vector<1x40x32xbf16>
    %112 = vector.shape_cast %111 : vector<1x40x32xbf16> to vector<40x32xbf16>
    %cst_86 = arith.constant dense<0.000000e+00> : vector<64x32xf32>
    %113 = tpu.matmul %110, %112, %cst_86 {dimension_numbers = #tpu.dot_dimension_numbers<[1], [0], [0], [1], [0, 0, 1, 1], [], []>} : vector<64x40xbf16>, vector<40x32xbf16>, vector<64x32xf32> -> vector<64x32xf32>
    %114 = arith.addf %108, %113 : vector<64x32xf32>
    %115 = vector.extract_strided_slice %77 {offsets = [2, 0, 0], sizes = [8, 8, 40], strides = [1, 1, 1]} : vector<10x10x40xbf16> to vector<8x8x40xbf16>
    %116 = vector.shape_cast %115 : vector<8x8x40xbf16> to vector<64x40xbf16>
    %c6_87 = arith.constant 6 : index
    %c0_88 = arith.constant 0 : index
    %c0_89 = arith.constant 0 : index
    %117 = vector.load %arg5[%c6_87, %c0_88, %c0_89] : memref<9x40x32xbf16, #tpu.memory_space<vmem>>, vector<1x40x32xbf16>
    %118 = vector.shape_cast %117 : vector<1x40x32xbf16> to vector<40x32xbf16>
    %cst_90 = arith.constant dense<0.000000e+00> : vector<64x32xf32>
    %119 = tpu.matmul %116, %118, %cst_90 {dimension_numbers = #tpu.dot_dimension_numbers<[1], [0], [0], [1], [0, 0, 1, 1], [], []>} : vector<64x40xbf16>, vector<40x32xbf16>, vector<64x32xf32> -> vector<64x32xf32>
    %120 = arith.addf %114, %119 : vector<64x32xf32>
    %121 = vector.extract_strided_slice %77 {offsets = [2, 1, 0], sizes = [8, 8, 40], strides = [1, 1, 1]} : vector<10x10x40xbf16> to vector<8x8x40xbf16>
    %122 = vector.shape_cast %121 : vector<8x8x40xbf16> to vector<64x40xbf16>
    %c7_91 = arith.constant 7 : index
    %c0_92 = arith.constant 0 : index
    %c0_93 = arith.constant 0 : index
    %123 = vector.load %arg5[%c7_91, %c0_92, %c0_93] : memref<9x40x32xbf16, #tpu.memory_space<vmem>>, vector<1x40x32xbf16>
    %124 = vector.shape_cast %123 : vector<1x40x32xbf16> to vector<40x32xbf16>
    %cst_94 = arith.constant dense<0.000000e+00> : vector<64x32xf32>
    %125 = tpu.matmul %122, %124, %cst_94 {dimension_numbers = #tpu.dot_dimension_numbers<[1], [0], [0], [1], [0, 0, 1, 1], [], []>} : vector<64x40xbf16>, vector<40x32xbf16>, vector<64x32xf32> -> vector<64x32xf32>
    %126 = arith.addf %120, %125 : vector<64x32xf32>
    %127 = vector.extract_strided_slice %77 {offsets = [2, 2, 0], sizes = [8, 8, 40], strides = [1, 1, 1]} : vector<10x10x40xbf16> to vector<8x8x40xbf16>
    %128 = vector.shape_cast %127 : vector<8x8x40xbf16> to vector<64x40xbf16>
    %c8_95 = arith.constant 8 : index
    %c0_96 = arith.constant 0 : index
    %c0_97 = arith.constant 0 : index
    %129 = vector.load %arg5[%c8_95, %c0_96, %c0_97] : memref<9x40x32xbf16, #tpu.memory_space<vmem>>, vector<1x40x32xbf16>
    %130 = vector.shape_cast %129 : vector<1x40x32xbf16> to vector<40x32xbf16>
    %cst_98 = arith.constant dense<0.000000e+00> : vector<64x32xf32>
    %131 = tpu.matmul %128, %130, %cst_98 {dimension_numbers = #tpu.dot_dimension_numbers<[1], [0], [0], [1], [0, 0, 1, 1], [], []>} : vector<64x40xbf16>, vector<40x32xbf16>, vector<64x32xf32> -> vector<64x32xf32>
    %132 = arith.addf %126, %131 : vector<64x32xf32>
    %c0_99 = arith.constant 0 : index
    %c0_100 = arith.constant 0 : index
    %133 = vector.load %arg6[%c0_99, %c0_100] : memref<1x32xf32, #tpu.memory_space<vmem>>, vector<1x32xf32>
    %134 = vector.broadcast %133 : vector<1x32xf32> to vector<64x32xf32>
    %135 = arith.addf %132, %134 : vector<64x32xf32>
    %c0_101 = arith.constant 0 : index
    %c0_102 = arith.constant 0 : index
    %c0_103 = arith.constant 0 : index
    %c0_104 = arith.constant 0 : index
    %136 = vector.load %arg2[%c0_101, %c0_102, %c0_103, %c0_104] : memref<1x8x8x32xf32, #tpu.memory_space<vmem>>, vector<1x8x8x32xf32>
    %137 = vector.shape_cast %136 : vector<1x8x8x32xf32> to vector<8x8x32xf32>
    %138 = vector.shape_cast %137 : vector<8x8x32xf32> to vector<64x32xf32>
    %139 = arith.addf %135, %138 : vector<64x32xf32>
    %cst_105 = arith.constant 0.000000e+00 : f32
    %140 = vector.broadcast %cst_105 : f32 to vector<64x32xf32>
    %141 = arith.maximumf %139, %140 : vector<64x32xf32>
    %142 = vector.shape_cast %141 : vector<64x32xf32> to vector<8x8x32xf32>
    %c0_106 = arith.constant 0 : index
    %c0_107 = arith.constant 0 : index
    %c0_108 = arith.constant 0 : index
    %c0_109 = arith.constant 0 : index
    %143 = vector.load %arg7[%c0_106, %c0_107, %c0_108, %c0_109] : memref<1x8x8x32xf32, #tpu.memory_space<vmem>>, vector<1x8x8x32xf32>
    %144 = vector.shape_cast %143 : vector<1x8x8x32xf32> to vector<8x8x32xf32>
    %145 = vector.shape_cast %142 : vector<8x8x32xf32> to vector<1x8x8x32xf32>
    tpu.vector_store %arg7[%c0_106, %c0_107, %c0_108, %c0_109], %145 {strides = array<i32>} : memref<1x8x8x32xf32, #tpu.memory_space<vmem>>, vector<1x8x8x32xf32>,
    return
  }
  func.func @transform_0(%arg0: i32) -> (i32, i32, i32, i32) {
    %c0_i32 = arith.constant 0 : i32
    %c0_i32_0 = arith.constant 0 : i32
    %c0_i32_1 = arith.constant 0 : i32
    %c0_i32_2 = arith.constant 0 : i32
    return %arg0, %c0_i32, %c0_i32_0, %c0_i32_1 : i32, i32, i32, i32
  }
  func.func @transform_1(%arg0: i32) -> (i32, i32, i32, i32) {
    %c0_i32 = arith.constant 0 : i32
    %c0_i32_0 = arith.constant 0 : i32
    %c0_i32_1 = arith.constant 0 : i32
    %c0_i32_2 = arith.constant 0 : i32
    return %arg0, %c0_i32, %c0_i32_0, %c0_i32_1 : i32, i32, i32, i32
  }
  func.func @transform_2(%arg0: i32) -> (i32, i32, i32) {
    %c0_i32 = arith.constant 0 : i32
    %c0_i32_0 = arith.constant 0 : i32
    %c0_i32_1 = arith.constant 0 : i32
    %c0_i32_2 = arith.constant 0 : i32
    return %c0_i32, %c0_i32_0, %c0_i32_1 : i32, i32, i32
  }
  func.func @transform_3(%arg0: i32) -> (i32, i32) {
    %c0_i32 = arith.constant 0 : i32
    %c0_i32_0 = arith.constant 0 : i32
    %c0_i32_1 = arith.constant 0 : i32
    return %c0_i32, %c0_i32_0 : i32, i32
  }
  func.func @transform_4(%arg0: i32) -> (i32, i32, i32) {
    %c0_i32 = arith.constant 0 : i32
    %c0_i32_0 = arith.constant 0 : i32
    %c0_i32_1 = arith.constant 0 : i32
    %c0_i32_2 = arith.constant 0 : i32
    return %c0_i32, %c0_i32_0, %c0_i32_1 : i32, i32, i32
  }
  func.func @transform_5(%arg0: i32) -> (i32, i32) {
    %c0_i32 = arith.constant 0 : i32
    %c0_i32_0 = arith.constant 0 : i32
    %c0_i32_1 = arith.constant 0 : i32
    return %c0_i32, %c0_i32_0 : i32, i32
  }
  func.func @transform_6(%arg0: i32) -> (i32, i32, i32, i32) {
    %c0_i32 = arith.constant 0 : i32
    %c0_i32_0 = arith.constant 0 : i32
    %c0_i32_1 = arith.constant 0 : i32
    %c0_i32_2 = arith.constant 0 : i32
    return %arg0, %c0_i32, %c0_i32_0, %c0_i32_1 : i32, i32, i32, i32
  }
}

</mosaic_0001>

<bundles_post_ra>
// kernel: basic_block_pallas.1
= control target key start
LH: loop header
LB: loop body
LE: loop exit
PB: predicated region body
PF: predicated region fallthrough
CT: control target
= control target key end

     0   :  { %s4167_s21 = smov 0   ;;  %s5198_s0 = inlined_call_operand.vmem [shape: bf16[2,10,10,40], index: 0, kind: input, shape index: {}]   ;;  %s5199_s1 = inlined_call_operand.vmem [shape: f32[2,8,8,32], index: 1, kind: input, shape index: {}]   ;;  %s5200_s2 = inlined_call_operand.vmem [shape: bf16[9,40,32], index: 2, kind: input, shape index: {}]   ;;  %s5201_s3 = inlined_call_operand.vmem [shape: f32[1,32], index: 3, kind: input, shape index: {}]   ;;  %s5202_s4 = inlined_call_operand.vmem [shape: bf16[9,40,32], index: 4, kind: input, shape index: {}]   ;;  %s5203_s5 = inlined_call_operand.vmem [shape: f32[1,32], index: 5, kind: input, shape index: {}]   ;;  %s5204_s6 = inlined_call_operand.vmem [shape: f32[2,8,8,32], index: 6, kind: output, shape index: {}]  }
   0x1 LB: > { %s3208_s22 = sadd.s32 4294967295, %s4128_s21   ;;  %p3212_p0 = scmp.ge.s32.totalorder %s4128_s21, 1  ;;  %s4128_s21 = sphi %s4167_s21, %s16_s21  }
   0x2   : > { %p222_p1 = scmp.lt.s32.totalorder %s4128_s21, 3 }
   0x4   : > { %p223_p2 = pnand %p3212_p0, %p222_p1 }
   0x5   : > { %v4055_v0 = vld [vmem:[%s5200_s2 + $0x14] sm:$0xff] (!%p223_p2)   ;;  %v4056_v1 = vld [vmem:[%s5200_s2 + $0x1c] sm:$0xff] (!%p223_p2)   ;;  %p257_p3 = scmp.lt.s32.totalorder (!%p223_p2), %s3208_s22, 1  ;;  %v4057_v2 = vld [vmem:[%s5200_s2 + $0x24] ss:$0 sps:$4 sm:$0xff] (!%p223_p2)   ;;  %vm624_vm0 = vcmask (!%p223_p2), 1043456  }
   0x6   : > { %226 = sbr.rel (%p223_p2) target bundleno = 894 (0x37e), region = 44  ;;  %3646 = vmatprep.subr.bf16.mxu0 (!%p223_p2), %v4055_v0  ;;  %v626_v3 = vsel (!%p223_p2), %vm624_vm0, %v4057_v2, 0  ;;  %v4196_v4 = vld [vmem:[%s5200_s2] sm:$0xff] (!%p223_p2)   ;;  %vm463_vm1 = vsmask.f32 (!%p223_p2), 3328  ;;  %vm611_vm4 = vcmask (!%p223_p2), 326656  }
   0x7   : > { %3647 = vmatpush3.bf16.msra.mxu0 (!%p223_p2), %v4055_v0  ;;  %vm464_vm2 = vsmask.f32 (!%p223_p2), 7440  ;;  %vm816_vm5 = vcmask (!%p223_p2), 1042432   ;;  %vm817_vm6 = vcmask (!%p223_p2), 1046532   ;;  %vm275_vm8 = vcmask (!%p223_p2), 319488   ;;  %s4131_s16 = smov (!%p223_p2), 4  }
   0x8   : > { %3648 = vmatprep.subr.bf16.mxu0 (!%p223_p2), %v4056_v1  ;;  %vm4243_vm3 = vmor (!%p223_p2), %vm463_vm1, %vm464_vm2  ;;  %vm282_vm9 = vsmask.f32 (!%p223_p2), 256  ;;  %vm334_vm11 = vcmask (!%p223_p2), 27648   ;;  %vm308_vm12 = vsmask.f32 (!%p223_p2), 7938  ;;  %vm386_vm14 = vcmask (!%p223_p2), 322848  }
   0x9   : > { %vm4374_vm7 = vmor (!%p223_p2), %vm816_vm5, %vm817_vm6  ;;  %vm339_vm2 = vcmask (!%p223_p2), 24576   ;;  %vm391_vm6 = vcmask (!%p223_p2), 319776  }
   0xa   : > { %vm4585_vm10 = vmand (!%p223_p2), %vm275_vm8, %vm282_vm9 }
   0xb   : > { %3649 = vmatpush3.bf16.msra.mxu0 (!%p223_p2), %v4056_v1  ;;  %vm4592_vm13 = vmand (!%p223_p2), %vm334_vm11, %vm308_vm12 }
   0xc   : > { %4026 = vmatprep.subr.msk.bf16.mxu0 (!%p223_p2), %vm624_vm0, %v4057_v2  ;;  %v4059_v2 = vld [vmem:[%s5200_s2 + $0x8] sm:$0xff] (!%p223_p2)   ;;  %vm4599_vm15 = vmand (!%p223_p2), %vm386_vm14, %vm308_vm12  ;;  %vm273_vm14 = vcmask (!%p223_p2), 322560  }
   0xd   : > { %s5226_s22 = smov (!%p257_p3, %s3208_s22), 1  ;;  %vm4607_vm1 = vmand %vm275_vm8, %vm308_vm12 }
   0xe   : > { %s4044_s29 = smul.u32 80, %s5226_s22  ;;  %vm4624_vm5 = vmand %vm339_vm2, %vm282_vm9 }
   0xf   : > { %3651 = vmatpush3.bf16.msra.mxu0 %v626_v3  ;;  %vm4649_vm11 = vmand %vm391_vm6, %vm282_vm9 }
  0x10   : > { %s4191_s8 = scalar_lea.vmem %s5198_s0, %s4044_s29  ;;  %3660 = vmatprep.subr.bf16.mxu0 %v4196_v4  ;;  %s3510_s29 = sshll.u32 %s5226_s22, 6 }
  0x11   : > { %v4200_v5 = vld [vmem:[%s4191_s8] sm:$0xf]  ;;  %v4203_v6 = vld [vmem:[%s4191_s8 + $0x4] sm:$0x1]  ;;  %v4206_v7 = vld [vmem:[%s4191_s8 + $0x8] sm:$0xf]  ;;  %s5161_s9 = scalar_lea.vmem %s5199_s1, %s3510_s29 }
  0x12   : > { %v4209_v8 = vld [vmem:[%s4191_s8 + $0xc] sm:$0x1]  ;;  %v4212_v9 = vld [vmem:[%s4191_s8 + $0x10] sm:$0xf]  ;;  %v4215_v10 = vld [vmem:[%s4191_s8 + $0x14] sm:$0x1] }
  0x13   : > { %v4218_v11 = vld [vmem:[%s4191_s8 + $0x18] sm:$0xf]  ;;  %v467_v12 = vshrl.u32 %v4200_v5, 16  ;;  %v470_v13 = vshll.u32 %v4200_v5, 16  ;;  %v476_v14 = vshll.u32 %v4203_v6, 16  ;;  %v481_v15 = vshrl.u32 %v4206_v7, 16 }
  0x14   : > { %v4225_v16 = vld [vmem:[%s4191_s8 + $0x1c] sm:$0x1]  ;;  %v484_v17 = vshll.u32 %v4206_v7, 16  ;;  %v490_v18 = vshll.u32 %v4209_v8, 16  ;;  %v495_v19 = vshrl.u32 %v4212_v9, 16  ;;  %v498_v20 = vshll.u32 %v4212_v9, 16 }
  0x15   : > { %v4233_v21 = vld [vmem:[%s4191_s8 + $0x20] sm:$0xf]  ;;  %v469_v22 = vrot.slane %v467_v12, 4  ;;  %v472_v23 = vrot.slane %v470_v13, 5  ;;  %v478_v24 = vrot.slane %v476_v14, 5  ;;  %v483_v25 = vrot.slane %v481_v15, 4 }
  0x16   : > { %v486_v26 = vrot.slane %v484_v17, 5  ;;  %v492_v27 = vrot.slane %v490_v18, 5  ;;  %v497_v28 = vrot.slane %v495_v19, 4  ;;  %v500_v29 = vrot.slane %v498_v20, 5  ;;  %v4239_v34 = vld [vmem:[%s4191_s8 + $0x24] sm:$0x1] }
  0x17   : > { %v473_v30 = vor.u32 %v472_v23, %v469_v22  ;;  %v504_v31 = vshll.u32 %v4215_v10, 16  ;;  %v509_v32 = vshrl.u32 %v4218_v11, 16  ;;  %v512_v33 = vshll.u32 %v4218_v11, 16  ;;  %v4253_v51 = vld [vmem:[%s4191_s8 + $0x28] sm:$0xf] }
  0x18   : > { %v487_v36 = vor.u32 %v486_v26, %v483_v25  ;;  %v501_v37 = vor.u32 %v500_v29, %v497_v28  ;;  %v518_v38 = vshll.u32 %v4225_v16, 16  ;;  %v523_v39 = vshrl.u32 %v4233_v21, 16  ;;  %v4261_v54 = vld [vmem:[%s4191_s8 + $0x2c] sm:$0x1]  ;;  %v4269_v59 = vld [vmem:[%s4191_s8 + $0x30] sm:$0xf] }
  0x19   : > { %v474_v40 = vrot.slane %v473_v30, 4  ;;  %v506_v41 = vrot.slane %v504_v31, 5  ;;  %v511_v42 = vrot.slane %v509_v32, 4  ;;  %v514_v43 = vrot.slane %v512_v33, 5  ;;  %v4272_v60 = vld [vmem:[%s4191_s8 + $0x34] sm:$0x1] }
  0x1a   : > { %v488_v44 = vrot.slane %v487_v36, 4  ;;  %v502_v45 = vrot.slane %v501_v37, 4  ;;  %v520_v46 = vrot.slane %v518_v38, 5  ;;  %v525_v49 = vrot.slane %v523_v39, 4  ;;  %v4275_v61 = vld [vmem:[%s4191_s8 + $0x38] sm:$0xf] }
  0x1b   : > { %v479_v47 = vsel %vm4243_vm3, %v474_v40, %v478_v24  ;;  %v515_v48 = vor.u32 %v514_v43, %v511_v42  ;;  %v526_v50 = vshll.u32 %v4233_v21, 16  ;;  %v532_v53 = vshll.u32 %v4239_v34, 16  ;;  %v4292_v12 = vld [vmem:[%s4191_s8 + $0x3c] sm:$0x1]  ;;  %v4060_v25 = vld [vmem:[%s5200_s2 + $0x10] ss:$0 sps:$4 sm:$0xff]  }
  0x1c   : > { %v4257_v52 = vsel %vm4243_vm3, %v488_v44, %v492_v27  ;;  %v4265_v55 = vsel %vm4243_vm3, %v502_v45, %v506_v41  ;;  %v537_v0 = vshrl.u32 %v4253_v51, 16  ;;  %v540_v3 = vshll.u32 %v4253_v51, 16  ;;  %v4062_v43 = vld [vmem:[%s5200_s2 + $0x28] sm:$0xff]  }
  0x1d   : > { %v516_v56 = vrot.slane %v515_v48, 4  ;;  %v528_v57 = vrot.slane %v526_v50, 5  ;;  %v3223_v58 = vcombine.low %v479_v47, %v4257_v52  ;;  %v534_v14 = vrot.slane %v532_v53, 5  ;;  %v4343_v50 = vld [vmem:[%s4191_s8 + $0x44] sm:$0x1] }
  0x1e   : > { %v539_v15 = vrot.slane %v537_v0, 4  ;;  %v546_v17 = vshll.u32 %v4261_v54, 16  ;;  %v542_v18 = vrot.slane %v540_v3, 5  ;;  %v551_v19 = vshrl.u32 %v4269_v59, 16  ;;  %v4347_v53 = vld [vmem:[%s4191_s8 + $0x40] sm:$0xf] }
  0x1f   : > { %v4279_v62 = vsel %vm4243_vm3, %v516_v56, %v520_v46  ;;  %v529_v63 = vor.u32 %v528_v57, %v525_v49  ;;  %3652 = vmatprep.mubr.msk.bf16.mxu0 %vm611_vm4, %v3223_v58  ;;  %v554_v20 = vshll.u32 %v4269_v59, 16  ;;  %v560_v22 = vshll.u32 %v4272_v60, 16  ;;  %v4067_v56 = vld [vmem:[%s5200_s2 + $0x38] ss:$0 sps:$4 sm:$0xff]  }
  0x20   : > { %v4285_v1 = vcombine.low %v4265_v55, %v4279_v62  ;;  %v565_v23 = vshrl.u32 %v4275_v61, 16  ;;  %v568_v24 = vshll.u32 %v4275_v61, 16  ;;  %v543_v26 = vor.u32 %v542_v18, %v539_v15 }
  0x21   : > { %v530_v13 = vrot.slane %v529_v63, 4  ;;  %v548_v27 = vrot.slane %v546_v17, 5  ;;  %v553_v28 = vrot.slane %v551_v19, 4  ;;  %v556_v29 = vrot.slane %v554_v20, 5 }
  0x22   : > { %3653 = vmatmul.mubr.msk.bf16.vlgmr.msra.gmra.mrb[0].mxu0 %vm611_vm4, %v4285_v1  ;;  %v567_v30 = vrot.slane %v565_v23, 4  ;;  %v570_v31 = vrot.slane %v568_v24, 5  ;;  %v574_v32 = vshll.u32 %v4292_v12, 16  ;;  %v544_v33 = vrot.slane %v543_v26, 4 }
  0x23   : > { %3661 = vmatpush3.bf16.msra.mxu0 %v4196_v4  ;;  %v4309_v4 = vsel %vm4243_vm3, %v530_v13, %v534_v14  ;;  %v557_v36 = vor.u32 %v556_v29, %v553_v28  ;;  %v562_v37 = vrot.slane %v560_v22, 5  ;;  %v741_v42 = vsel %vm624_vm0, %v4060_v25, 0 }
  0x24   : > { %3662 = vmatprep.subr.bf16.mxu0 %v4059_v2  ;;  %v571_v38 = vor.u32 %v570_v31, %v567_v30  ;;  %v576_v39 = vrot.slane %v574_v32, 5  ;;  %v4313_v40 = vsel %vm4243_vm3, %v544_v33, %v548_v27  ;;  %v3234_v48 = vcombine.low %v4200_v5, %v4206_v7 }
  0x25   : > { %v558_v41 = vrot.slane %v557_v36, 4  ;;  %v4322_v44 = vcombine.low %v4309_v4, %v4313_v40  ;;  %v1088_v57 = vshrl.u32 %v4347_v53, 16  ;;  %v1091_v58 = vshll.u32 %v4347_v53, 16 }
  0x26   : > { %v572_v45 = vrot.slane %v571_v38, 4  ;;  %v1097_v63 = vshll.u32 %v4343_v50, 16  ;;  %v821_v0 = vrot.slane %v4203_v6, 5  ;;  %v825_v14 = vrot.slane %v4209_v8, 5  ;;  %v4064_v6 = vld [vmem:[%s5200_s2 + $0x30] sm:$0xff]  }
  0x27   : > { %3663 = vmatpush3.bf16.msra.mxu0 %v4059_v2  ;;  %v4326_v46 = vsel %vm4243_vm3, %v558_v41, %v562_v37  ;;  %3656 = vmatprep.mubr.msk.bf16.mxu0 %vm611_vm4, %v4322_v44  ;;  %v4358_v2 = vcombine.low %v4212_v9, %v4218_v11  ;;  %v1090_v3 = vrot.slane %v1088_v57, 4  ;;  %v1093_v13 = vrot.slane %v1091_v58, 5  ;;  %v4070_v58 = vld [vmem:[%s5200_s2 + $0x4c] ss:$0 sps:$4 sm:$0xff]   ;;  %v3110_v8 = vld [vmem:[%s5161_s9 + $0x10] sm:$0xff] }
  0x28   : > { %4027 = vmatprep.subr.msk.bf16.mxu0 %vm624_vm0, %v4060_v25  ;;  %v4332_v47 = vsel %vm4243_vm3, %v572_v45, %v576_v39  ;;  %v3247_v15 = vrot.slane %v4212_v9, 9  ;;  %v829_v17 = vrot.slane %v4215_v10, 5  ;;  %v4365_v18 = vcombine.low %v4233_v21, %v4253_v51  ;;  %v4069_v45 = vld [vmem:[%s5200_s2 + $0x44] sm:$0xff]  }
  0x29   : > { %v4338_v49 = vcombine.low %v4326_v46, %v4332_v47  ;;  %v3245_v19 = vrot.slane %v4200_v5, 9  ;;  %v3246_v20 = vrot.slane %v4206_v7, 9  ;;  %v1094_v22 = vor.u32 %v1093_v13, %v1090_v3  ;;  %v4072_v13 = vld [vmem:[%s5200_s2 + $0x50] sm:$0xff]  }
  0x2a   : > { %v1099_v23 = vrot.slane %v1097_v63, 5  ;;  %v3248_v10 = vrot.slane %v4218_v11, 9  ;;  %v833_v24 = vrot.slane %v4225_v16, 5  ;;  %v897_v25 = vsel %vm624_vm0, %v4067_v56, 0 }
  0x2b   : > { %3665 = vmatpush3.bf16.msra.mxu0 %v741_v42  ;;  %v3249_v26 = vrot.slane %v4233_v21, 9  ;;  %v837_v5 = vrot.slane %v4239_v34, 5  ;;  %v3250_v27 = vrot.slane %v4253_v51, 9  ;;  %v841_v28 = vrot.slane %v4261_v54, 5 }
  0x2c   : > { %3674 = vmatprep.subr.bf16.mxu0 %v4062_v43  ;;  %3657 = vmatmul.mubr.msk.bf16.gmra.mrb[4].mxu0 %vm611_vm4, %v4338_v49  ;;  %v1095_v29 = vrot.slane %v1094_v22, 4  ;;  %v3251_v16 = vrot.slane %v4269_v59, 9  ;;  %v845_v30 = vrot.slane %v4272_v60, 5  ;;  %v822_v31 = vsel %vm4374_vm7, %v3245_v19, %v821_v0  ;;  %v4068_v60 = vld [vmem:[%s5200_s2 + $0x3c] sm:$0xff]  }
  0x2d   : > { %3666 = vmatprep.mubr.msk.bf16.mxu0 %vm611_vm4, %v3234_v48  ;;  %v4395_v34 = vsel %vm4374_vm7, %v3246_v20, %v825_v14  ;;  %v4405_v33 = vcombine.low %v4269_v59, %v4275_v61  ;;  %v3252_v36 = vrot.slane %v4275_v61, 9  ;;  %v849_v37 = vrot.slane %v4292_v12, 5  ;;  %v4082_v22 = vld [vmem:[%s5200_s2 + $0x80] sm:$0xff]  }
  0x2e   : > { %v4399_v54 = vsel %vm4243_vm3, %v1095_v29, %v1099_v23  ;;  %v3258_v38 = vcombine.low %v822_v31, %v4395_v34  ;;  %v830_v39 = vsel %vm4374_vm7, %v3247_v15, %v829_v17  ;;  %v4420_v41 = vsel %vm4374_vm7, %v3248_v10, %v833_v24  ;;  %v4077_v15 = vld [vmem:[%s5200_s2 + $0x60] ss:$0 sps:$4 sm:$0xff]   ;;  %v4080_v17 = vld [vmem:[%s5200_s2 + $0x74] ss:$0 sps:$4 sm:$0xff]   ;;  %v4083_v23 = vld [vmem:[%s5200_s2 + $0x88] ss:$0 sps:$4 sm:$0xff]  }
  0x2f   : > { %v3293_v32 = vcombine.low %v4332_v47, %v4399_v54  ;;  %v4425_v12 = vsel %vm4374_vm7, %v3249_v26, %v837_v5  ;;  %v4429_v42 = vsel %vm4374_vm7, %v3250_v27, %v841_v28  ;;  %v4449_v57 = vsel %vm4374_vm7, %v3252_v36, %v849_v37  ;;  %v4084_v24 = vld [vmem:[%s5200_s2 + $0x8c] sm:$0xff]   ;;  %v456_v26 = vld [vmem:[%s4191_s8 + $0x48] sm:$0xf] }
  0x30   : > { %v4439_v48 = vcombine.low %v4425_v12, %v4429_v42  ;;  %v3274_v0 = vcombine.low %v4206_v7, %v4212_v9  ;;  %v1012_v3 = vsel %vm624_vm0, %v4070_v58, 0  ;;  %v3275_v14 = vcombine.low %v4218_v11, %v4233_v21  ;;  %v4074_v9 = vld [vmem:[%s5200_s2 + $0x58] sm:$0xff]   ;;  %v457_v31 = vld [vmem:[%s4191_s8 + $0x4c] sm:$0x1]  ;;  %s5173_s8 = scalar_lea.vmem %s5204_s6, %s3510_s29 }
  0x31   : > { %v3276_v7 = vcombine.low %v4253_v51, %v4269_v59  ;;  %v3277_v11 = vcombine.low %v4275_v61, %v4347_v53  ;;  %v3290_v21 = vcombine.low %v4257_v52, %v4265_v55  ;;  %v1140_v51 = vsel %vm624_vm0, %v4077_v15, 0  ;;  %v4078_v59 = vld [vmem:[%s5200_s2 + $0x64] sm:$0xff]   ;;  %v4079_v55 = vld [vmem:[%s5200_s2 + $0x6c] sm:$0xff]  }
  0x32   : > { %v3291_v61 = vcombine.low %v4279_v62, %v4309_v4  ;;  %v3292_v52 = vcombine.low %v4313_v40, %v4326_v46  ;;  %v3307_v62 = vcombine.low %v4395_v34, %v830_v39  ;;  %v1259_v4 = vsel %vm624_vm0, %v4080_v17, 0  ;;  %v4081_v40 = vld [vmem:[%s5200_s2 + $0x78] sm:$0xff]  }
  0x33   : > { %v3308_v46 = vcombine.low %v4420_v41, %v4425_v12  ;;  %v3301_v19 = vrot.slane %v4347_v53, 9  ;;  %v1218_v20 = vrot.slane %v4343_v50, 5  ;;  %v1362_v10 = vsel %vm624_vm0, %v4083_v23, 0  ;;  %v4093_v12 = vld [vmem:[%s5202_s4 + $0x24] ss:$0 sps:$4 sm:$0xff]  }
  0x34   : > { %3667 = vmatmul.mubr.msk.bf16.vlgmr.msra.gmra.mrb[0].mxu0 %vm611_vm4, %v4358_v2  ;;  %v1438_v5 = vshrl.u32 %v456_v26, 16  ;;  %v1441_v27 = vshll.u32 %v456_v26, 16  ;;  %v3323_v28 = vcombine.low %v4347_v53, %v456_v26  ;;  %v1447_v53 = vshll.u32 %v457_v31, 16 }
  0x35   : > { %3675 = vmatpush3.bf16.msra.mxu0 %v4062_v43  ;;  %3670 = vmatprep.mubr.msk.bf16.mxu0 %vm611_vm4, %v4365_v18  ;;  %v4432_v43 = vcombine.low %v830_v39, %v4420_v41  ;;  %v1219_v47 = vsel %vm4374_vm7, %v3301_v19, %v1218_v20  ;;  %v290_v41 = vld [vmem:[#allocation2 + $0x18] sm:$0x1]  ;;  %v296_v20 = vld [vmem:[#allocation2 + $0x28] sm:$0x1] }
  0x36   : > { %3676 = vmatprep.subr.bf16.mxu0 %v4064_v6  ;;  %v3310_v50 = vcombine.low %v4449_v57, %v1219_v47  ;;  %v1440_v29 = vrot.slane %v1438_v5, 4 }
  0x39   : > { %3677 = vmatpush3.bf16.msra.mxu0 %v4064_v6 }
  0x3a   : > { %4028 = vmatprep.subr.msk.bf16.mxu0 %vm624_vm0, %v4067_v56  ;;  %v846_v56 = vsel %vm4374_vm7, %v3251_v16, %v845_v30  ;;  %v1443_v16 = vrot.slane %v1441_v27, 5  ;;  %v4088_v30 = vld [vmem:[%s5200_s2 + $0xa0] sm:$0xff]   ;;  %v322_v27 = vld [vmem:[#allocation2 + $0x2c] sm:$0x1] }
  0x3b   : > { %v4455_v63 = vcombine.low %v846_v56, %v4449_v57  ;;  %v3309_v6 = vcombine.low %v4429_v42, %v846_v56  ;;  %v291_v42 = vsel %vm4585_vm10, 0, %v290_v41 }
  0x3c   : > { %3671 = vmatmul.mubr.msk.bf16.gmra.mrb[4].mxu0 %vm611_vm4, %v4405_v33  ;;  %v1444_v34 = vor.u32 %v1443_v16, %v1440_v29  ;;  %292 = vst [vmem:[#allocation2 + $0x18] sm:$0x1] %v291_v42  ;;  %v299_v29 = vld [vmem:[#allocation2 + $0x30] sm:$0x1] }
  0x3d   : > { %3679 = vmatpush3.bf16.msra.mxu0 %v897_v25  ;;  %3680 = vmatprep.mubr.msk.bf16.mxu0 %vm611_vm4, %v3258_v38  ;;  %v4085_v25 = vld [vmem:[%s5200_s2 + $0x94] sm:$0xff]  }
  0x3e   : > { %3688 = vmatprep.subr.bf16.mxu0 %v4068_v60 }
  0x44   : > { %3681 = vmatmul.mubr.msk.bf16.vlgmr.msra.gmra.mrb[0].mxu0 %vm611_vm4, %v4432_v43 }
  0x45   : > { %3689 = vmatpush3.bf16.msra.mxu0 %v4068_v60  ;;  %3684 = vmatprep.mubr.msk.bf16.mxu0 %vm611_vm4, %v4439_v48  ;;  %v4089_v60 = vld [vmem:[%s5200_s2 + $0xa8] sm:$0xff]  }
  0x46   : > { %3690 = vmatprep.subr.bf16.mxu0 %v4069_v45 }
  0x49   : > { %3691 = vmatpush3.bf16.msra.mxu0 %v4069_v45  ;;  %v350_v45 = vld [vmem:[#allocation2 + $0x18] sm:$0xf] }
  0x4a   : > { %4029 = vmatprep.subr.msk.bf16.mxu0 %vm624_vm0, %v4070_v58 }
  0x4c   : > { %3685 = vmatmul.mubr.msk.bf16.gmra.mrb[4].mxu0 %vm611_vm4, %v4455_v63 }
  0x4d   : > { %3693 = vmatpush3.bf16.msra.mxu0 %v1012_v3  ;;  %3694 = vmatprep.mubr.msk.bf16.mxu0 %vm611_vm4, %v3274_v0 }
  0x4e   : > { %3702 = vmatprep.subr.bf16.mxu0 %v4072_v13 }
  0x54   : > { %3695 = vmatmul.mubr.msk.bf16.vlgmr.msra.gmra.mrb[0].mxu0 %vm611_vm4, %v3275_v14 }
  0x55   : > { %3703 = vmatpush3.bf16.msra.mxu0 %v4072_v13  ;;  %3698 = vmatprep.mubr.msk.bf16.mxu0 %vm611_vm4, %v3276_v7  ;;  %v316_v13 = vld [vmem:[#allocation2 + $0x1c] sm:$0x1]  ;;  %v293_v7 = vld [vmem:[#allocation2 + $0x20] sm:$0x1] }
  0x56   : > { %3704 = vmatprep.subr.bf16.mxu0 %v4074_v9  ;;  %v317_v14 = vsel %vm4607_vm1, 0, %v316_v13 }
  0x57   : > { %318 = vst [vmem:[#allocation2 + $0x1c] sm:$0x1] %v317_v14 }
  0x59   : > { %3705 = vmatpush3.bf16.msra.mxu0 %v4074_v9  ;;  %v294_v9 = vsel %vm4585_vm10, 0, %v293_v7 }
  0x5a   : > { %4030 = vmatprep.subr.msk.bf16.mxu0 %vm624_vm0, %v4077_v15  ;;  %295 = vst [vmem:[#allocation2 + $0x20] sm:$0x1] %v294_v9  ;;  %v310_v15 = vld [vmem:[#allocation2 + $0xc] sm:$0x1] }
  0x5c   : > { %3699 = vmatmul.mubr.msk.bf16.gmra.mrb[4].mxu0 %vm611_vm4, %v3277_v11  ;;  %v311_v11 = vsel %vm4607_vm1, 0, %v310_v15 }
  0x5d   : > { %3707 = vmatpush3.bf16.msra.mxu0 %v1140_v51  ;;  %3708 = vmatprep.mubr.msk.bf16.mxu0 %vm611_vm4, %v3290_v21  ;;  %v319_v21 = vld [vmem:[#allocation2 + $0x24] sm:$0x1]  ;;  %312 = vst [vmem:[#allocation2 + $0xc] sm:$0x1] %v311_v11 }
  0x5e   : > { %3716 = vmatprep.subr.bf16.mxu0 %v4078_v59 }
  0x64   : > { %3709 = vmatmul.mubr.msk.bf16.vlgmr.msra.gmra.mrb[0].mxu0 %vm611_vm4, %v3291_v61 }
  0x65   : > { %3717 = vmatpush3.bf16.msra.mxu0 %v4078_v59  ;;  %3712 = vmatprep.mubr.msk.bf16.mxu0 %vm611_vm4, %v3292_v52  ;;  %v320_v59 = vsel %vm4607_vm1, 0, %v319_v21  ;;  %v302_v52 = vld [vmem:[#allocation2 + $0x38] sm:$0x1] }
  0x66   : > { %3718 = vmatprep.subr.bf16.mxu0 %v4079_v55  ;;  %321 = vst [vmem:[#allocation2 + $0x24] sm:$0x1] %v320_v59 }
  0x69   : > { %3719 = vmatpush3.bf16.msra.mxu0 %v4079_v55 }
  0x6a   : > { %4031 = vmatprep.subr.msk.bf16.mxu0 %vm624_vm0, %v4080_v17  ;;  %v353_v17 = vld [vmem:[#allocation2 + $0x1c] sm:$0x1] }
  0x6c   : > { %3713 = vmatmul.mubr.msk.bf16.gmra.mrb[4].mxu0 %vm611_vm4, %v3293_v32  ;;  %v1445_v32 = vrot.slane %v1444_v34, 4  ;;  %v300_v34 = vsel %vm4585_vm10, 0, %v299_v29 }
  0x6d   : > { %3721 = vmatpush3.bf16.msra.mxu0 %v1259_v4  ;;  %3722 = vmatprep.mubr.msk.bf16.mxu0 %vm611_vm4, %v3307_v62  ;;  %v303_v62 = vsel %vm4585_vm10, 0, %v302_v52  ;;  %v287_v4 = vld [vmem:[#allocation2 + $0x10] sm:$0x1]  ;;  %301 = vst [vmem:[#allocation2 + $0x30] sm:$0x1] %v300_v34 }
  0x6e   : > { %3730 = vmatprep.subr.bf16.mxu0 %v4081_v40  ;;  %304 = vst [vmem:[#allocation2 + $0x38] sm:$0x1] %v303_v62 }
  0x74   : > { %3723 = vmatmul.mubr.msk.bf16.vlgmr.msra.gmra.mrb[0].mxu0 %vm611_vm4, %v3308_v46  ;;  %v356_v46 = vld [vmem:[#allocation2 + $0x20] sm:$0xf]  ;;  %v368_v52 = vld [vmem:[#allocation2 + $0x30] sm:$0xf] }
  0x75   : > { %3731 = vmatpush3.bf16.msra.mxu0 %v4081_v40  ;;  %3726 = vmatprep.mubr.msk.bf16.mxu0 %vm611_vm4, %v3309_v6  ;;  %v354_v40 = vsel %vm4624_vm5, 0, %v353_v17  ;;  %v288_v6 = vsel %vm4585_vm10, 0, %v287_v4  ;;  %v357_v19 = vsel %vm4592_vm13, 0, %v356_v46  ;;  %v4130_v17 = vmov 0  }
  0x76   : > { %3732 = vmatprep.subr.bf16.mxu0 %v4082_v22  ;;  %355 = vst [vmem:[#allocation2 + $0x1c] sm:$0x1] %v354_v40  ;;  %289 = vst [vmem:[#allocation2 + $0x10] sm:$0x1] %v288_v6 }
  0x77   : > { %358 = vst [vmem:[#allocation2 + $0x20] sm:$0xf] %v357_v19  ;;  %274 = vst.msk [vmem:[#allocation2] sm:$0xf] %vm273_vm14, %v4130_v17 }
  0x78   : > { %276 = vst.msk [vmem:[#allocation2 + $0x4] sm:$0x1] %vm275_vm8, %v4130_v17  ;;  %279 = vst.msk [vmem:[#allocation2 + $0x4c] sm:$0x1] %vm275_vm8, %v4130_v17  ;;  %vm1827_vm8 = vcmask 289824  }
  0x79   : > { %3733 = vmatpush3.bf16.msra.mxu0 %v4082_v22  ;;  %v341_v22 = vld [vmem:[#allocation2 + $0xc] sm:$0x1]  ;;  %278 = vst.msk [vmem:[#allocation2 + $0x48] sm:$0xf] %vm273_vm14, %v4130_v17 }
  0x7a   : > { %4032 = vmatprep.subr.msk.bf16.mxu0 %vm624_vm0, %v4083_v23  ;;  %v313_v23 = vld [vmem:[#allocation2 + $0x14] sm:$0x1] }
  0x7c   : > { %3727 = vmatmul.mubr.msk.bf16.gmra.mrb[4].mxu0 %vm611_vm4, %v3310_v50  ;;  %v342_v50 = vsel %vm4624_vm5, 0, %v341_v22 }
  0x7d   : > { %3735 = vmatpush3.bf16.msra.mxu0 %v1362_v10  ;;  %3736 = vmatprep.mubr.msk.bf16.mxu0 %vm611_vm4, %v4358_v2  ;;  %v4087_v2 = vld [vmem:[%s5200_s2 + $0x9c] ss:$0 sps:$4 sm:$0xff]   ;;  %v359_v10 = vld [vmem:[#allocation2 + $0x24] sm:$0x1]  ;;  %343 = vst [vmem:[#allocation2 + $0xc] sm:$0x1] %v342_v50 }
  0x7e   : > { %3744 = vmatprep.subr.bf16.mxu0 %v4084_v24 }
  0x84   : > { %3737 = vmatmul.mubr.msk.bf16.vlgmr.msra.gmra.mrb[0].mxu0 %vm611_vm4, %v4365_v18  ;;  %v1478_v18 = vsel %vm624_vm0, %v4087_v2, 0 }
  0x85   : > { %3745 = vmatpush3.bf16.msra.mxu0 %v4084_v24  ;;  %3740 = vmatprep.mubr.msk.bf16.mxu0 %vm611_vm4, %v4405_v33  ;;  %v1449_v33 = vrot.slane %v1447_v53, 5  ;;  %v314_v24 = vsel %vm4607_vm1, 0, %v313_v23 }
  0x86   : > { %3746 = vmatprep.subr.bf16.mxu0 %v4085_v25  ;;  %315 = vst [vmem:[#allocation2 + $0x14] sm:$0x1] %v314_v24 }
  0x87   : > { %v1450_v36 = vsel %vm4243_vm3, %v1445_v32, %v1449_v33  ;;  %v408_v32 = vld [vmem:[#allocation2 + $0x20] sm:$0xf] }
  0x88   : > { %v3336_v37 = vcombine.low %v4399_v54, %v1450_v36  ;;  %v409_v36 = vsel %vm4599_vm15, 0, %v408_v32 }
  0x89   : > { %3747 = vmatpush3.bf16.msra.mxu0 %v4085_v25  ;;  %410 = vst [vmem:[#allocation2 + $0x20] sm:$0xf] %v409_v36 }
  0x8a   : > { %4033 = vmatprep.subr.msk.bf16.mxu0 %vm624_vm0, %v4087_v2  ;;  %v374_v2 = vld [vmem:[#allocation2 + $0x38] sm:$0xf] }
  0x8c   : > { %3741 = vmatmul.mubr.msk.bf16.gmra.mrb[4].mxu0 %vm611_vm4, %v3323_v28  ;;  %v323_v28 = vsel %vm4607_vm1, 0, %v322_v27 }
  0x8d   : > { %3749 = vmatpush3.bf16.msra.mxu0 %v1478_v18  ;;  %3750 = vmatprep.mubr.msk.bf16.mxu0 %vm611_vm4, %v4285_v1  ;;  %v4090_v1 = vld [vmem:[%s5200_s2 + $0xb0] ss:$0 sps:$4 sm:$0xff]   ;;  %v405_v18 = vld [vmem:[#allocation2 + $0x1c] sm:$0x1]  ;;  %324 = vst [vmem:[#allocation2 + $0x2c] sm:$0x1] %v323_v28 }
  0x8e   : > { %3758 = vmatprep.subr.bf16.mxu0 %v4088_v30  ;;  %v1585_v38 = vsel %vm624_vm0, %v4090_v1, 0  ;;  %v406_v53 = vsel %vm4649_vm11, 0, %v405_v18  ;;  %v347_v41 = vld [vmem:[#allocation2 + $0x14] sm:$0x1] }
  0x8f   : > { %407 = vst [vmem:[#allocation2 + $0x1c] sm:$0x1] %v406_v53 }
  0x94   : > { %3751 = vmatmul.mubr.msk.bf16.vlgmr.msra.gmra.mrb[0].mxu0 %vm611_vm4, %v4322_v44  ;;  %v3344_v44 = vrot.slane %v456_v26, 9  ;;  %v360_v26 = vsel %vm4624_vm5, 0, %v359_v10  ;;  %v365_v11 = vld [vmem:[#allocation2 + $0x2c] sm:$0x1] }
  0x95   : > { %3759 = vmatpush3.bf16.msra.mxu0 %v4088_v30  ;;  %3754 = vmatprep.mubr.msk.bf16.mxu0 %vm611_vm4, %v4338_v49  ;;  %v1556_v49 = vrot.slane %v457_v31, 5  ;;  %361 = vst [vmem:[#allocation2 + $0x24] sm:$0x1] %v360_v26  ;;  %v375_v30 = vsel %vm4592_vm13, 0, %v374_v2  ;;  %v344_v31 = vld [vmem:[#allocation2 + $0x10] sm:$0xf] }
  0x96   : > { %3760 = vmatprep.subr.bf16.mxu0 %v4089_v60  ;;  %376 = vst [vmem:[#allocation2 + $0x38] sm:$0xf] %v375_v30  ;;  %v345_v33 = vsel %vm4592_vm13, 0, %v344_v31 }
  0x97   : > { %v1557_v54 = vsel %vm4374_vm7, %v3344_v44, %v1556_v49  ;;  %346 = vst [vmem:[#allocation2 + $0x10] sm:$0xf] %v345_v33  ;;  %v325_v44 = vld [vmem:[#allocation2 + $0x34] sm:$0x1] }
  0x98   : > { %v3350_v39 = vcombine.low %v1219_v47, %v1557_v54  ;;  %v297_v47 = vsel %vm4585_vm10, 0, %v296_v20  ;;  %v393_v54 = vld [vmem:[#allocation2 + $0xc] sm:$0x1]  ;;  %v369_v20 = vsel %vm4592_vm13, 0, %v368_v52 }
  0x99   : > { %3761 = vmatpush3.bf16.msra.mxu0 %v4089_v60  ;;  %298 = vst [vmem:[#allocation2 + $0x28] sm:$0x1] %v297_v47  ;;  %v4664_v60 = vld [vmem:[%s5201_s3] ss:$0 sm:$0xff]  ;;  %370 = vst [vmem:[#allocation2 + $0x30] sm:$0xf] %v369_v20 }
  0x9a   : > { %4034 = vmatprep.subr.msk.bf16.mxu0 %vm624_vm0, %v4090_v1  ;;  %v328_v1 = vld [vmem:[#allocation2 + $0x3c] sm:$0x1] }
  0x9c   : > { %3755 = vmatmul.mubr.msk.bf16.gmra.mrb[4].mxu0 %vm611_vm4, %v3336_v37 }
  0x9d   : > { %3763 = vmatpush3.bf16.msra.mxu0 %v1585_v38  ;;  %3764 = vmatprep.mubr.msk.bf16.mxu0 %vm611_vm4, %v4432_v43  ;;  %v329_v38 = vsel %vm4607_vm1, 0, %v328_v1  ;;  %v426_v59 = vld [vmem:[#allocation2 + $0x38] sm:$0xf] }
  0x9e   : > { %330 = vst [vmem:[#allocation2 + $0x3c] sm:$0x1] %v329_v38  ;;  %v427_v40 = vsel %vm4599_vm15, 0, %v426_v59  ;;  %v396_v46 = vld [vmem:[#allocation2 + $0x10] sm:$0xf] }
  0x9f   : > { %428 = vst [vmem:[#allocation2 + $0x38] sm:$0xf] %v427_v40  ;;  %v397_v19 = vsel %vm4599_vm15, 0, %v396_v46  ;;  %v331_v59 = vld [vmem:[#allocation2 + $0x44] sm:$0x1]  ;;  %v4091_v40 = vld [vmem:[%s5202_s4 + $0x14] sm:$0xff]  }
  0xa0   : > { %v362_v37 = vld [vmem:[#allocation2 + $0x28] sm:$0xf]  ;;  %398 = vst [vmem:[#allocation2 + $0x10] sm:$0xf] %v397_v19  ;;  %3772 = vmatprep.subr.bf16.mxu1 %v4091_v40 }
  0xa1   : > { %3773 = vmatpush3.bf16.msra.mxu1 %v4091_v40 }
  0xa4   : > { %3765 = vmatmul.mubr.msk.bf16.vlgmr.msra.gmra.mrb[0].mxu0 %vm611_vm4, %v4439_v48  ;;  %v351_v48 = vsel %vm4592_vm13, 0, %v350_v45 }
  0xa5   : > { %3768 = vmatprep.mubr.msk.bf16.mxu0 %vm611_vm4, %v4455_v63  ;;  %352 = vst [vmem:[#allocation2 + $0x18] sm:$0xf] %v351_v48  ;;  %v284_v63 = vld [vmem:[#allocation2 + $0x8] sm:$0x1]  ;;  %v394_v48 = vsel %vm4649_vm11, 0, %v393_v54 }
  0xa6   : > { %v285_v3 = vsel %vm4585_vm10, 0, %v284_v63  ;;  %v326_v63 = vsel %vm4607_vm1, 0, %v325_v44  ;;  %395 = vst [vmem:[#allocation2 + $0xc] sm:$0x1] %v394_v48  ;;  %v377_v50 = vld [vmem:[#allocation2 + $0x3c] sm:$0x1] }
  0xa7   : > { %286 = vst [vmem:[#allocation2 + $0x8] sm:$0x1] %v285_v3  ;;  %327 = vst [vmem:[#allocation2 + $0x34] sm:$0x1] %v326_v63 }
  0xac   : > { %3769 = vmatmul.mubr.msk.bf16.gmra.mrb[4].mxu0 %vm611_vm4, %v3350_v39  ;;  %v402_v57 = vld [vmem:[#allocation2 + $0x18] sm:$0xf]  ;;  %v363_v39 = vsel %vm4592_vm13, 0, %v362_v37 }
  0xad   : > { %v403_v58 = vsel %vm4599_vm15, 0, %v402_v57  ;;  %v411_v57 = vld [vmem:[#allocation2 + $0x24] sm:$0x1]  ;;  %364 = vst [vmem:[#allocation2 + $0x28] sm:$0xf] %v363_v39 }
  0xae   : > { %404 = vst [vmem:[#allocation2 + $0x18] sm:$0xf] %v403_v58  ;;  %v336_v51 = vld [vmem:[#allocation2 + $0x8] sm:$0xf]  ;;  %v348_v58 = vsel %vm4624_vm5, 0, %v347_v41  ;;  %v412_v14 = vsel %vm4649_vm11, 0, %v411_v57 }
  0xaf   : > { %v337_v61 = vsel %vm4592_vm13, 0, %v336_v51  ;;  %349 = vst [vmem:[#allocation2 + $0x14] sm:$0x1] %v348_v58  ;;  %413 = vst [vmem:[#allocation2 + $0x24] sm:$0x1] %v412_v14 }
  0xb0   : > { %338 = vst [vmem:[#allocation2 + $0x8] sm:$0xf] %v337_v61  ;;  %v366_v61 = vsel %vm4624_vm5, 0, %v365_v11 }
  0xb1   : > { %367 = vst [vmem:[#allocation2 + $0x2c] sm:$0x1] %v366_v61 }
  0xb4   : > { %v414_v54 = vld [vmem:[#allocation2 + $0x28] sm:$0xf] }
  0xb7   : > { %v388_v25 = vld [vmem:[#allocation2 + $0x8] sm:$0xf] }
  0xb8   : > { %v389_v5 = vsel %vm4599_vm15, 0, %v388_v25  ;;  %v378_v25 = vsel %vm4624_vm5, 0, %v377_v50  ;;  %v417_v63 = vld [vmem:[#allocation2 + $0x2c] sm:$0x1]  ;;  %v332_v50 = vsel %vm4607_vm1, 0, %v331_v59 }
  0xb9   : > { %390 = vst [vmem:[#allocation2 + $0x8] sm:$0xf] %v389_v5  ;;  %379 = vst [vmem:[#allocation2 + $0x3c] sm:$0x1] %v378_v25 }
  0xba   : > { %333 = vst [vmem:[#allocation2 + $0x44] sm:$0x1] %v332_v50 }
 0x177   : > { %v3766_v49 = vpop.f32.mrb[0].mxu0 }
 0x178   : > { %v1669_v42 = vadd.f32 %v3766_v49, %v4664_v60  ;;  %v1621_v45 = vpop.f32.mrb[1].mxu0 }
 0x179   : > { %v1667_v3 = vadd.f32 %v4664_v60, %v1621_v45  ;;  %v3767_v13 = vpop.f32.mrb[2].mxu0  ;;  %v399_v45 = vld [vmem:[#allocation2 + $0x14] sm:$0x1] }
 0x17a   : > { %v1677_v7 = vmax.f32 %v1669_v42, 0.0  ;;  %v1670_v9 = vadd.f32 %v3767_v13, %v4664_v60  ;;  %v1624_v15 = vpop.f32.mrb[3].mxu0  ;;  %v420_v13 = vld [vmem:[#allocation2 + $0x30] sm:$0xf] }
 0x17b   : > { %v1675_v21 = vmax.f32 %v1667_v3, 0.0  ;;  %v1668_v51 = vadd.f32 %v4664_v60, %v1624_v15  ;;  %v415_v3 = vsel %vm4599_vm15, 0, %v414_v54 }
 0x17c   : > { %v3514_v62 = vpack.c.bf16 %v1677_v7, %v1677_v7  ;;  %v1678_v4 = vmax.f32 %v1670_v9, 0.0  ;;  %416 = vst [vmem:[#allocation2 + $0x28] sm:$0xf] %v415_v3  ;;  %v400_v7 = vsel %vm4649_vm11, 0, %v399_v45  ;;  %v429_v9 = vld [vmem:[#allocation2 + $0x3c] sm:$0x1] }
 0x17d   : > { %v3512_v6 = vpack.c.bf16 %v1675_v21, %v1675_v21  ;;  %v1676_v23 = vmax.f32 %v1668_v51, 0.0  ;;  %401 = vst [vmem:[#allocation2 + $0x14] sm:$0x1] %v400_v7  ;;  %v418_v51 = vsel %vm4649_vm11, 0, %v417_v63  ;;  %v430_v46 = vsel %vm4649_vm11, 0, %v429_v9 }
 0x17e   : > { %v1732_v22 = vshrl.u32 %v3514_v62, 16  ;;  %v3515_v47 = vpack.c.bf16 %v1678_v4, %v1678_v4  ;;  %v1735_v28 = vshll.u32 %v3514_v62, 16  ;;  %419 = vst [vmem:[#allocation2 + $0x2c] sm:$0x1] %v418_v51  ;;  %v371_v62 = vld [vmem:[#allocation2 + $0x34] sm:$0x1] }
 0x17f   : > { %v1716_v10 = vshrl.u32 %v3512_v6, 16  ;;  %v3770_v24 = vpop.f32.mrb[4].mxu0  ;;  %v1719_v31 = vshll.u32 %v3512_v6, 16  ;;  %v3513_v34 = vpack.c.bf16 %v1676_v23, %v1676_v23  ;;  %v305_v6 = vld [vmem:[#allocation2 + $0x40] sm:$0x1]  ;;  %v372_v23 = vsel %vm4624_vm5, 0, %v371_v62 }
 0x180   : > { %v1740_v26 = vshrl.u32 %v3515_v47, 16  ;;  %v1673_v5 = vadd.f32 %v3770_v24, %v4664_v60  ;;  %v1637_v27 = vpop.f32.mrb[5].mxu0  ;;  %v1734_v2 = vrot.slane %v1732_v22, 7  ;;  %v1743_v49 = vshll.u32 %v3515_v47, 16  ;;  %431 = vst [vmem:[#allocation2 + $0x3c] sm:$0x1] %v430_v46 }
 0x181   : > { %v1671_v29 = vadd.f32 %v4664_v60, %v1637_v27  ;;  %v3771_v18 = vpop.f32.mrb[6].mxu0  ;;  %v1718_v30 = vrot.slane %v1716_v10, 7  ;;  %v1724_v48 = vshrl.u32 %v3513_v34, 16  ;;  %v1727_v19 = vshll.u32 %v3513_v34, 16  ;;  %373 = vst [vmem:[#allocation2 + $0x34] sm:$0x1] %v372_v23 }
 0x182   : > { %v1681_v53 = vmax.f32 %v1673_v5, 0.0  ;;  %v1640_v32 = vpop.f32.mrb[7].mxu0  ;;  %v1737_v33 = vor.u32 %v1735_v28, %v1734_v2  ;;  %v1742_v36 = vrot.slane %v1740_v26, 7  ;;  %v1738_v42 = vrot.slane %v1734_v2, 4  ;;  %v4092_v5 = vld [vmem:[%s5202_s4 + $0x1c] sm:$0xff]  }
 0x183   : > { %v1679_v1 = vmax.f32 %v1671_v29, 0.0  ;;  %v1672_v37 = vadd.f32 %v4664_v60, %v1640_v32  ;;  %v1721_v38 = vor.u32 %v1719_v31, %v1718_v30  ;;  %v1674_v14 = vadd.f32 %v3771_v18, %v4664_v60  ;;  %3774 = vmatprep.subr.bf16.mxu1 %v4092_v5  ;;  %v383_v34 = vld [vmem:[#allocation2 + $0x44] sm:$0x1]  ;;  %v1829_v63 = vld [vmem:[#allocation2 + $0x8] sm:$0xf] }
 0x184   : > { %v3518_v44 = vpack.c.bf16 %v1681_v53, %v1681_v53  ;;  %1787 = vrot.lane.b32.xlu1 %v1737_v33, %s4131_s16  ;;  %v1745_v58 = vor.u32 %v1743_v49, %v1742_v36  ;;  %v1722_v21 = vrot.slane %v1718_v30, 4  ;;  %v1726_v61 = vrot.slane %v1724_v48, 7  ;;  %3775 = vmatpush3.bf16.msra.mxu1 %v4092_v5  ;;  %v4743_v32 = vld [vmem:[%s5202_s4] sm:$0xff]   ;;  %v1846_v7 = vld [vmem:[#allocation2 + $0x1c] sm:$0x1] }
 0x185   : > { %1779 = vrot.lane.b32.xlu0 %v1721_v38, %s4131_s16  ;;  %v3516_v41 = vpack.c.bf16 %v1679_v1, %v1679_v1  ;;  %v1680_v57 = vmax.f32 %v1672_v37, 0.0  ;;  %v1746_v17 = vrot.slane %v1742_v36, 4  ;;  %v421_v60 = vsel %vm4599_vm15, 0, %v420_v13  ;;  %4035 = vmatprep.subr.msk.bf16.mxu1 %vm624_vm0, %v4093_v12  ;;  %v1849_v9 = vld [vmem:[#allocation2 + $0x20] sm:$0xf] }
 0x186   : > { %v1764_v39 = vshrl.u32 %v3518_v44, 16  ;;  %v1767_v4 = vshll.u32 %v3518_v44, 16  ;;  %422 = vst [vmem:[#allocation2 + $0x30] sm:$0xf] %v421_v60  ;;  %v1682_v20 = vmax.f32 %v1674_v14, 0.0  ;;  %v1729_v24 = vor.u32 %v1727_v19, %v1726_v61 }
 0x187   : > { %v1748_v11 = vshrl.u32 %v3516_v41, 16  ;;  %v3517_v52 = vpack.c.bf16 %v1680_v57, %v1680_v57  ;;  %v306_v25 = vsel %vm4585_vm10, 0, %v305_v6  ;;  %v1751_v26 = vshll.u32 %v3516_v41, 16  ;;  %vm4764_vm10 = vmand %vm1827_vm8, %vm308_vm12  ;;  %v1852_v60 = vld [vmem:[#allocation2 + $0x24] sm:$0x1] }
 0x188   : > { %1789 = vrot.lane.b32.xlu1 %v1738_v42, %s4131_s16  ;;  %v4708_v15 = vrot.slane %v1764_v39, 7  ;;  %307 = vst [vmem:[#allocation2 + $0x40] sm:$0x1] %v306_v25  ;;  %v3519_v27 = vpack.c.bf16 %v1682_v20, %v1682_v20  ;;  %v1730_v28 = vrot.slane %v1726_v61, 4  ;;  %v423_v31 = vld [vmem:[#allocation2 + $0x34] sm:$0x1] }
 0x189   : > { %1791 = vrot.lane.b32.xlu0 %v1745_v58, %s4131_s16  ;;  %v1750_v22 = vrot.slane %v1748_v11, 7  ;;  %v1756_v10 = vshrl.u32 %v3517_v52, 16  ;;  %v1759_v18 = vshll.u32 %v3517_v52, 16  ;;  %v2062_v53 = vsel %vm624_vm0, %v4093_v12, 0  ;;  %v1843_v58 = vld [vmem:[#allocation2 + $0x18] sm:$0xf] }
 0x18a   : > { %v1769_v47 = vor.u32 %v1767_v4, %v4708_v15  ;;  %v1772_v29 = vshrl.u32 %v3519_v27, 16  ;;  %v424_v36 = vsel %vm4649_vm11, 0, %v423_v31  ;;  %v384_v1 = vsel %vm4624_vm5, 0, %v383_v34  ;;  %3777 = vmatpush3.bf16.msra.mxu1 %v2062_v53  ;;  %v4787_v19 = vld [vmem:[#allocation2 + $0x4] sm:$0x1] }
 0x18b   : > { %v1753_v0 = vor.u32 %v1751_v26, %v1750_v22  ;;  %v1758_v2 = vrot.slane %v1756_v10, 7  ;;  %v1754_v30 = vrot.slane %v1750_v22, 4  ;;  %425 = vst [vmem:[#allocation2 + $0x34] sm:$0x1] %v424_v36  ;;  %385 = vst [vmem:[#allocation2 + $0x44] sm:$0x1] %v384_v1  ;;  %3786 = vmatprep.subr.bf16.mxu1 %v4743_v32 }
 0x18c   : > { %1781 = vrot.lane.b32.xlu1 %v1722_v21, %s4131_s16  ;;  %v1774_v44 = vrot.slane %v1772_v29, 7  ;;  %v1770_v49 = vrot.slane %v4708_v15, 4  ;;  %v1775_v55 = vshll.u32 %v3519_v27, 16  ;;  %v4777_v15 = vld [vmem:[#allocation2] sm:$0xf]  ;;  %v1914_v5 = vshll.u32 %v4787_v19, 16 }
 0x18d   : > { %1793 = vrot.lane.b32.xlu0 %v1746_v17, %s4131_s16  ;;  %v1761_v33 = vor.u32 %v1759_v18, %v1758_v2  ;;  %v1762_v54 = vrot.slane %v1758_v2, 4  ;;  %v1905_v21 = vshrl.u32 %v4777_v15, 16  ;;  %v1908_v51 = vshll.u32 %v4777_v15, 16  ;;  %v1834_v17 = vld [vmem:[#allocation2 + $0xc] sm:$0x1] }
 0x18e   : > { %v1778_v39 = vrot.slane %v1774_v44, 4  ;;  %v1777_v41 = vor.u32 %v1775_v55, %v1774_v44  ;;  %v1867_v22 = vld [vmem:[#allocation2 + $0x38] sm:$0xf]  ;;  %v1837_v23 = vld [vmem:[#allocation2 + $0x10] sm:$0xf]  ;;  %v1916_v36 = vrot.slane %v1914_v5, 5 }
 0x18f   : > { %v380_v37 = vld [vmem:[#allocation2 + $0x40] sm:$0xf]  ;;  %v1907_v4 = vrot.slane %v1905_v21, 4  ;;  %v1910_v40 = vrot.slane %v1908_v51, 5  ;;  %v1855_v29 = vld [vmem:[#allocation2 + $0x28] sm:$0xf] }
 0x190   : > { %1803 = vrot.lane.b32.xlu1 %v1769_v47, %s4131_s16  ;;  %v381_v38 = vsel %vm4592_vm13, 0, %v380_v37  ;;  %vm1832_vm13 = vcmask 286752   ;;  %v1840_v34 = vld [vmem:[#allocation2 + $0x14] sm:$0x1]  ;;  %v1870_v51 = vld [vmem:[#allocation2 + $0x3c] sm:$0x1] }
 0x191   : > { %1783 = vrot.lane.b32.xlu0 %v1729_v24, %s4131_s16  ;;  %382 = vst [vmem:[#allocation2 + $0x40] sm:$0xf] %v381_v38  ;;  %v1911_v26 = vor.u32 %v1910_v40, %v1907_v4 }
 0x192   : > { %v435_v42 = vld [vmem:[#allocation2 + $0x44] sm:$0x1] }
 0x193   : > { %v436_v43 = vsel %vm4649_vm11, 0, %v435_v42 }
 0x194   : > { %1795 = vrot.lane.b32.xlu1 %v1753_v0, %s4131_s16  ;;  %437 = vst [vmem:[#allocation2 + $0x44] sm:$0x1] %v436_v43 }
 0x195   : > { %1785 = vrot.lane.b32.xlu0 %v1730_v28, %s4131_s16 }
 0x198   : > { %1797 = vrot.lane.b32.xlu1 %v1754_v30, %s4131_s16  ;;  %v432_v45 = vld [vmem:[#allocation2 + $0x40] sm:$0xf] }
 0x199   : > { %1799 = vrot.lane.b32.xlu0 %v1761_v33, %s4131_s16  ;;  %v433_v48 = vsel %vm4599_vm15, 0, %v432_v45  ;;  %vm4773_vm15 = vmand %vm1832_vm13, %vm282_vm9  ;;  %v1912_v33 = vrot.slane %v1911_v26, 4  ;;  %v1861_v45 = vld [vmem:[#allocation2 + $0x30] sm:$0xf] }
 0x19a   : > { %434 = vst [vmem:[#allocation2 + $0x40] sm:$0xf] %v433_v48 }
 0x19b   : > { %v1876_v5 = vld [vmem:[#allocation2 + $0x44] sm:$0x1] }
 0x19c   : > { %1805 = vrot.lane.b32.xlu1 %v1770_v49, %s4131_s16 }
 0x19d   : > { %1801 = vrot.lane.b32.xlu0 %v1762_v54, %s4131_s16 }
 0x1a0   : > { %1809 = vrot.lane.b32.xlu1 %v1778_v39, %s4131_s16  ;;  %v1858_v39 = vld [vmem:[#allocation2 + $0x2c] sm:$0x1] }
 0x1a1   : > { %1807 = vrot.lane.b32.xlu0 %v1777_v41, %s4131_s16 }
 0x1f6   : > { %v1788_v3 = vpop.permute.xlu1 %1787 }
 0x1f7   : > { %v1844_v16 = vsel %vm4764_vm10, %v1788_v3, %v1843_v58  ;;  %v1780_v13 = vpop.permute.xlu0 %1779 }
 0x1f8   : > { %1845 = vst [vmem:[#allocation2 + $0x18] sm:$0xf] %v1844_v16  ;;  %v1830_v56 = vsel %vm4764_vm10, %v1780_v13, %v1829_v63  ;;  %v1917_v63 = vsel %vm4243_vm3, %v1912_v33, %v1916_v36  ;;  %v1873_v33 = vld [vmem:[#allocation2 + $0x40] sm:$0xf] }
 0x1f9   : > { %1831 = vst [vmem:[#allocation2 + $0x8] sm:$0xf] %v1830_v56 }
 0x1fa   : > { %v1790_v11 = vpop.permute.xlu1 %1789 }
 0x1fb   : > { %v1847_v59 = vsel %vm4773_vm15, %v1790_v11, %v1846_v7  ;;  %v1792_v61 = vpop.permute.xlu0 %1791 }
 0x1fc   : > { %1848 = vst [vmem:[#allocation2 + $0x1c] sm:$0x1] %v1847_v59  ;;  %v1850_v52 = vsel %vm4764_vm10, %v1792_v61, %v1849_v9 }
 0x1fd   : > { %1851 = vst [vmem:[#allocation2 + $0x20] sm:$0xf] %v1850_v52 }
 0x1fe   : > { %v1782_v62 = vpop.permute.xlu1 %1781 }
 0x1ff   : > { %v1835_v46 = vsel %vm4773_vm15, %v1782_v62, %v1834_v17  ;;  %v1794_v6 = vpop.permute.xlu0 %1793  ;;  %v4793_v50 = vld [vmem:[#allocation2 + $0x18] sm:$0xf]  ;;  %v1864_v17 = vld [vmem:[#allocation2 + $0x34] sm:$0x1] }
 0x200   : > { %1836 = vst [vmem:[#allocation2 + $0xc] sm:$0x1] %v1835_v46  ;;  %v1853_v20 = vsel %vm4773_vm15, %v1794_v6, %v1852_v60  ;;  %v4791_v47 = vld [vmem:[#allocation2 + $0x8] sm:$0xf]  ;;  %v1947_v30 = vshrl.u32 %v4793_v50, 16  ;;  %v1950_v31 = vshll.u32 %v4793_v50, 16 }
 0x201   : > { %1854 = vst [vmem:[#allocation2 + $0x24] sm:$0x1] %v1853_v20  ;;  %v1919_v10 = vshrl.u32 %v4791_v47, 16  ;;  %v1922_v24 = vshll.u32 %v4791_v47, 16 }
 0x202   : > { %v1804_v25 = vpop.permute.xlu1 %1803  ;;  %v1949_v42 = vrot.slane %v1947_v30, 4  ;;  %v1952_v43 = vrot.slane %v1950_v31, 5 }
 0x203   : > { %v1868_v27 = vsel %vm4764_vm10, %v1804_v25, %v1867_v22  ;;  %v1784_v0 = vpop.permute.xlu0 %1783  ;;  %v1921_v2 = vrot.slane %v1919_v10, 4  ;;  %v1924_v28 = vrot.slane %v1922_v24, 5  ;;  %v4815_v58 = vld [vmem:[#allocation2 + $0x1c] sm:$0x1] }
 0x204   : > { %1869 = vst [vmem:[#allocation2 + $0x38] sm:$0xf] %v1868_v27  ;;  %v1838_v12 = vsel %vm4764_vm10, %v1784_v0, %v1837_v23  ;;  %v4802_v18 = vld [vmem:[#allocation2 + $0x20] sm:$0xf]  ;;  %v1953_v52 = vor.u32 %v1952_v43, %v1949_v42  ;;  %v1956_v40 = vshll.u32 %v4815_v58, 16 }
 0x205   : > { %1839 = vst [vmem:[#allocation2 + $0x10] sm:$0xf] %v1838_v12  ;;  %v1925_v1 = vor.u32 %v1924_v28, %v1921_v2  ;;  %v1961_v49 = vshrl.u32 %v4802_v18, 16  ;;  %v1964_v54 = vshll.u32 %v4802_v18, 16 }
 0x206   : > { %v1796_v53 = vpop.permute.xlu1 %1795 }
 0x207   : > { %v1856_v37 = vsel %vm4764_vm10, %v1796_v53, %v1855_v29  ;;  %v1786_v38 = vpop.permute.xlu0 %1785  ;;  %v4808_v44 = vld [vmem:[#allocation2 + $0xc] sm:$0x1]  ;;  %v1926_v3 = vrot.slane %v1925_v1, 4  ;;  %v1963_v7 = vrot.slane %v1961_v49, 4  ;;  %v1966_v9 = vrot.slane %v1964_v54, 5 }
 0x208   : > { %1857 = vst [vmem:[#allocation2 + $0x28] sm:$0xf] %v1856_v37  ;;  %v1841_v55 = vsel %vm4773_vm15, %v1786_v38, %v1840_v34  ;;  %v1928_v41 = vshll.u32 %v4808_v44, 16  ;;  %v4831_v60 = vld [vmem:[#allocation2 + $0x24] sm:$0x1]  ;;  %v1954_v34 = vrot.slane %v1953_v52, 4 }
 0x209   : > { %1842 = vst [vmem:[#allocation2 + $0x14] sm:$0x1] %v1841_v55  ;;  %v1967_v25 = vor.u32 %v1966_v9, %v1963_v7  ;;  %v1970_v2 = vshll.u32 %v4831_v60, 16  ;;  %v1958_v53 = vrot.slane %v1956_v40, 5 }
 0x20a   : > { %v1798_v48 = vpop.permute.xlu1 %1797  ;;  %v1930_v16 = vrot.slane %v1928_v41, 5 }
 0x20b   : > { %v1859_v13 = vsel %vm4773_vm15, %v1798_v48, %v1858_v39  ;;  %v1800_v56 = vpop.permute.xlu0 %1799  ;;  %v4821_v11 = vld [vmem:[#allocation2 + $0x38] sm:$0xf]  ;;  %v1968_v39 = vrot.slane %v1967_v25, 4  ;;  %v4867_v14 = vsel %vm4243_vm3, %v1954_v34, %v1958_v53  ;;  %v4098_v53 = vld [vmem:[%s5202_s4 + $0x30] sm:$0xff]  }
 0x20c   : > { %1860 = vst [vmem:[#allocation2 + $0x2c] sm:$0x1] %v1859_v13  ;;  %v1862_v21 = vsel %vm4764_vm10, %v1800_v56, %v1861_v45  ;;  %v4825_v59 = vld [vmem:[#allocation2 + $0x10] sm:$0xf]  ;;  %v4829_v61 = vsel %vm4243_vm3, %v1926_v3, %v1930_v16  ;;  %v2003_v20 = vshrl.u32 %v4821_v11, 16  ;;  %v2006_v22 = vshll.u32 %v4821_v11, 16 }
 0x20d   : > { %1863 = vst [vmem:[#allocation2 + $0x30] sm:$0xf] %v1862_v21  ;;  %v1933_v62 = vshrl.u32 %v4825_v59, 16  ;;  %v1936_v4 = vshll.u32 %v4825_v59, 16  ;;  %v3372_v46 = vcombine.low %v1917_v63, %v4829_v61  ;;  %v1972_v45 = vrot.slane %v1970_v2, 5 }
 0x20e   : > { %v1806_v6 = vpop.permute.xlu1 %1805  ;;  %v2005_v38 = vrot.slane %v2003_v20, 4  ;;  %v2008_v49 = vrot.slane %v2006_v22, 5  ;;  %v4928_v34 = vcombine.low %v4825_v59, %v4793_v50 }
 0x20f   : > { %v1871_v23 = vsel %vm4773_vm15, %v1806_v6, %v1870_v51  ;;  %v1935_v10 = vrot.slane %v1933_v62, 4  ;;  %v1938_v24 = vrot.slane %v1936_v4, 5  ;;  %3778 = vmatprep.mubr.msk.bf16.mxu1 %vm611_vm4, %v3372_v46  ;;  %v1802_v26 = vpop.permute.xlu0 %1801  ;;  %v4842_v27 = vld [vmem:[#allocation2 + $0x28] sm:$0xf]  ;;  %v4882_v40 = vsel %vm4243_vm3, %v1968_v39, %v1972_v45 }
 0x210   : > { %1872 = vst [vmem:[#allocation2 + $0x3c] sm:$0x1] %v1871_v23  ;;  %v4844_v0 = vld [vmem:[#allocation2 + $0x14] sm:$0x1]  ;;  %v1865_v28 = vsel %vm4773_vm15, %v1802_v26, %v1864_v17  ;;  %v1975_v12 = vshrl.u32 %v4842_v27, 16  ;;  %v1978_v29 = vshll.u32 %v4842_v27, 16  ;;  %v2009_v52 = vor.u32 %v2008_v49, %v2005_v38 }
 0x211   : > { %v1939_v30 = vor.u32 %v1938_v24, %v1935_v10  ;;  %v1942_v31 = vshll.u32 %v4844_v0, 16  ;;  %1866 = vst [vmem:[#allocation2 + $0x34] sm:$0x1] %v1865_v28  ;;  %v4095_v51 = vld [vmem:[%s5202_s4 + $0x8] sm:$0xff]   ;;  %v4096_v26 = vld [vmem:[%s5202_s4 + $0x10] ss:$0 sps:$4 sm:$0xff]  }
 0x212   : > { %v1810_v36 = vpop.permute.xlu1 %1809  ;;  %v1977_v1 = vrot.slane %v1975_v12, 4  ;;  %v1980_v37 = vrot.slane %v1978_v29, 5  ;;  %v2010_v24 = vrot.slane %v2009_v52, 4  ;;  %v2177_v29 = vsel %vm624_vm0, %v4096_v26, 0  ;;  %v4100_v49 = vld [vmem:[%s5202_s4 + $0x38] ss:$0 sps:$4 sm:$0xff]  }
 0x213   : > { %v1940_v54 = vrot.slane %v1939_v30, 4  ;;  %v1944_v55 = vrot.slane %v1942_v31, 5  ;;  %v1877_v41 = vsel %vm4773_vm15, %v1810_v36, %v1876_v5  ;;  %v1808_v42 = vpop.permute.xlu0 %1807  ;;  %v4854_v43 = vld [vmem:[#allocation2 + $0x2c] sm:$0x1]  ;;  %v3383_v31 = vcombine.low %v4777_v15, %v4791_v47 }
 0x214   : > { %1878 = vst [vmem:[#allocation2 + $0x44] sm:$0x1] %v1877_v41  ;;  %v1874_v48 = vsel %vm4764_vm10, %v1808_v42, %v1873_v33  ;;  %v1981_v63 = vor.u32 %v1980_v37, %v1977_v1  ;;  %v1984_v3 = vshll.u32 %v4854_v43, 16  ;;  %v4859_v16 = vld [vmem:[#allocation2 + $0x30] sm:$0xf]  ;;  %v4097_v30 = vld [vmem:[%s5202_s4 + $0x28] sm:$0xff]   ;;  %v4935_v33 = vcombine.low %v4802_v18, %v4842_v27 }
 0x215   : > { %v4863_v13 = vsel %vm4243_vm3, %v1940_v54, %v1944_v55  ;;  %1875 = vst [vmem:[#allocation2 + $0x40] sm:$0xf] %v1874_v48  ;;  %v1989_v56 = vshrl.u32 %v4859_v16, 16  ;;  %v1992_v7 = vshll.u32 %v4859_v16, 16  ;;  %v2254_v36 = vrot.slane %v4787_v19, 5  ;;  %v4101_v55 = vld [vmem:[%s5202_s4 + $0x3c] sm:$0xff]  }
 0x216   : > { %v4873_v57 = vcombine.low %v4863_v13, %v4867_v14  ;;  %v1982_v9 = vrot.slane %v1981_v63, 4  ;;  %v1986_v21 = vrot.slane %v1984_v3, 5  ;;  %v2258_v1 = vrot.slane %v4808_v44, 5 }
 0x217   : > { %v4878_v17 = vld [vmem:[#allocation2 + $0x3c] sm:$0x1]  ;;  %v1991_v62 = vrot.slane %v1989_v56, 4  ;;  %v1994_v4 = vrot.slane %v1992_v7, 5  ;;  %v3394_v37 = vrot.slane %v4777_v15, 9  ;;  %v3395_v38 = vrot.slane %v4791_v47, 9 }
 0x218   : > { %3779 = vmatmul.mubr.msk.bf16.vlgmr.msra.gmra.mrb[0].mxu1 %vm611_vm4, %v4873_v57  ;;  %v4888_v46 = vsel %vm4243_vm3, %v1982_v9, %v1986_v21  ;;  %v4890_v6 = vld [vmem:[#allocation2 + $0x34] sm:$0x1]  ;;  %v2012_v20 = vshll.u32 %v4878_v17, 16  ;;  %v4956_v15 = vcombine.low %v4859_v16, %v4821_v11  ;;  %v2330_v54 = vsel %vm624_vm0, %v4100_v49, 0  ;;  %v4102_v21 = vld [vmem:[%s5202_s4 + $0x44] sm:$0xff]  }
 0x219   : > { %3787 = vmatpush3.bf16.msra.mxu1 %v4743_v32  ;;  %v4896_v22 = vcombine.low %v4882_v40, %v4888_v46  ;;  %v1995_v23 = vor.u32 %v1994_v4, %v1991_v62  ;;  %v1998_v10 = vshll.u32 %v4890_v6, 16  ;;  %v2255_v19 = vsel %vm4374_vm7, %v3394_v37, %v2254_v36 }
 0x21a   : > { %3788 = vmatprep.subr.bf16.mxu1 %v4095_v51  ;;  %v2014_v25 = vrot.slane %v2012_v20, 5  ;;  %v4952_v44 = vsel %vm4374_vm7, %v3395_v38, %v2258_v1  ;;  %v2262_v39 = vrot.slane %v4844_v0, 5  ;;  %v2274_v42 = vrot.slane %v4854_v43, 5 }
 0x21b   : > { %3782 = vmatprep.mubr.msk.bf16.mxu1 %vm611_vm4, %v4896_v22  ;;  %v1996_v5 = vrot.slane %v1995_v23, 4  ;;  %v2000_v2 = vrot.slane %v1998_v10, 5  ;;  %v3407_v41 = vcombine.low %v2255_v19, %v4952_v44  ;;  %v3396_v45 = vrot.slane %v4825_v59, 9  ;;  %v4103_v23 = vld [vmem:[%s5202_s4 + $0x4c] ss:$0 sps:$4 sm:$0xff]  }
 0x21c   : > { %v4906_v32 = vsel %vm4243_vm3, %v2010_v24, %v2014_v25  ;;  %v2266_v48 = vrot.slane %v4815_v58, 5  ;;  %v2270_v63 = vrot.slane %v4831_v60, 5  ;;  %v3399_v3 = vrot.slane %v4842_v27, 9  ;;  %v4104_v25 = vld [vmem:[%s5202_s4 + $0x50] sm:$0xff]  }
 0x21d   : > { %3789 = vmatpush3.bf16.msra.mxu1 %v4095_v51  ;;  %v4910_v28 = vsel %vm4243_vm3, %v1996_v5, %v2000_v2  ;;  %v4975_v0 = vsel %vm4374_vm7, %v3396_v45, %v2262_v39  ;;  %v3397_v56 = vrot.slane %v4793_v50, 9  ;;  %v3398_v43 = vrot.slane %v4802_v18, 9  ;;  %v4106_v2 = vld [vmem:[%s5202_s4 + $0x58] sm:$0xff]   ;;  %v4113_v39 = vld [vmem:[%s5202_s4 + $0x80] sm:$0xff]  }
 0x21e   : > { %v4914_v12 = vcombine.low %v4910_v28, %v4906_v32  ;;  %4036 = vmatprep.subr.msk.bf16.mxu1 %vm624_vm0, %v4096_v26  ;;  %v4981_v7 = vsel %vm4374_vm7, %v3399_v3, %v2274_v42  ;;  %v2278_v52 = vrot.slane %v4890_v6, 5  ;;  %v2282_v62 = vrot.slane %v4878_v17, 5 }
 0x21f   : > { %v4985_v58 = vsel %vm4374_vm7, %v3397_v56, %v2266_v48  ;;  %v4993_v9 = vsel %vm4374_vm7, %v3398_v43, %v2270_v63  ;;  %v3400_v4 = vrot.slane %v4859_v16, 9  ;;  %v3401_v20 = vrot.slane %v4821_v11, 9  ;;  %v4116_v56 = vld [vmem:[%s5202_s4 + $0x94] sm:$0xff]   ;;  %v1897_v43 = vld [vmem:[#allocation2 + $0x48] sm:$0xf] }
 0x220   : > { %3783 = vmatmul.mubr.msk.bf16.gmra.mrb[4].mxu1 %vm611_vm4, %v4914_v12  ;;  %v4989_v60 = vcombine.low %v4975_v0, %v4985_v58  ;;  %v5000_v51 = vcombine.low %v4993_v9, %v4981_v7  ;;  %v2445_v24 = vsel %vm624_vm0, %v4103_v23, 0  ;;  %v3423_v26 = vcombine.low %v4791_v47, %v4825_v59  ;;  %v5043_v47 = vld [vmem:[#allocation2 + $0x40] sm:$0xf] }
 0x221   : > { %3792 = vmatprep.mubr.msk.bf16.mxu1 %vm611_vm4, %v3383_v31  ;;  %3791 = vmatpush3.bf16.msra.mxu1 %v2177_v29  ;;  %v5015_v6 = vsel %vm4374_vm7, %v3400_v4, %v2278_v52  ;;  %v5019_v17 = vsel %vm4374_vm7, %v3401_v20, %v2282_v62  ;;  %v3424_v5 = vcombine.low %v4793_v50, %v4802_v18  ;;  %v4108_v59 = vld [vmem:[%s5202_s4 + $0x60] ss:$0 sps:$4 sm:$0xff]   ;;  %v2521_v50 = vshrl.u32 %v5043_v47, 16  ;;  %v1898_v62 = vld [vmem:[#allocation2 + $0x4c] sm:$0x1] }
 0x222   : > { %3800 = vmatprep.subr.bf16.mxu1 %v4097_v30  ;;  %v5023_v10 = vcombine.low %v5015_v6, %v5019_v17  ;;  %v3425_v29 = vcombine.low %v4842_v27, %v4859_v16  ;;  %v2524_v18 = vshll.u32 %v5043_v47, 16  ;;  %v3426_v27 = vcombine.low %v4821_v11, %v5043_v47  ;;  %v1896_v11 = vld [vmem:[#allocation2 + $0x44] sm:$0x1] }
 0x223   : > { %v2573_v16 = vsel %vm624_vm0, %v4108_v59, 0  ;;  %v3439_v31 = vcombine.low %v4829_v61, %v4863_v13  ;;  %v2530_v37 = vshll.u32 %v1896_v11, 16  ;;  %v3440_v38 = vcombine.low %v4867_v14, %v4882_v40 }
 0x224   : > { %v2526_v36 = vrot.slane %v2524_v18, 5  ;;  %v3441_v61 = vcombine.low %v4888_v46, %v4910_v28  ;;  %v4112_v28 = vld [vmem:[%s5202_s4 + $0x78] sm:$0xff]   ;;  %v3450_v42 = vrot.slane %v5043_v47, 9  ;;  %v2651_v45 = vrot.slane %v1896_v11, 5 }
 0x225   : > { %v2532_v19 = vrot.slane %v2530_v37, 5  ;;  %v2880_v20 = vshll.u32 %v1898_v62, 16 }
 0x226   : > { %v2652_v48 = vsel %vm4374_vm7, %v3450_v42, %v2651_v45 }
 0x227   : > { %v3459_v63 = vcombine.low %v5019_v17, %v2652_v48  ;;  %v2882_v17 = vrot.slane %v2880_v20, 5 }
 0x228   : > { %3793 = vmatmul.mubr.msk.bf16.vlgmr.msra.gmra.mrb[0].mxu1 %vm611_vm4, %v4928_v34 }
 0x229   : > { %3801 = vmatpush3.bf16.msra.mxu1 %v4097_v30  ;;  %3796 = vmatprep.mubr.msk.bf16.mxu1 %vm611_vm4, %v4935_v33  ;;  %v4109_v30 = vld [vmem:[%s5202_s4 + $0x64] sm:$0xff]  }
 0x22a   : > { %3802 = vmatprep.subr.bf16.mxu1 %v4098_v53 }
 0x22d   : > { %3803 = vmatpush3.bf16.msra.mxu1 %v4098_v53  ;;  %v2523_v53 = vrot.slane %v2521_v50, 4  ;;  %v3111_v50 = vld [vmem:[%s5161_s9 + $0x18] sm:$0xff] }
 0x22e   : > { %4037 = vmatprep.subr.msk.bf16.mxu1 %vm624_vm0, %v4100_v49  ;;  %v4110_v49 = vld [vmem:[%s5202_s4 + $0x6c] sm:$0xff]  }
 0x22f   : > { %v2527_v1 = vor.u32 %v2526_v36, %v2523_v53 }
 0x230   : > { %3797 = vmatmul.mubr.msk.bf16.gmra.mrb[4].mxu1 %vm611_vm4, %v4956_v15 }
 0x231   : > { %3806 = vmatprep.mubr.msk.bf16.mxu1 %vm611_vm4, %v3407_v41  ;;  %3805 = vmatpush3.bf16.msra.mxu1 %v2330_v54  ;;  %v2528_v13 = vrot.slane %v2527_v1, 4  ;;  %v4111_v54 = vld [vmem:[%s5202_s4 + $0x74] ss:$0 sps:$4 sm:$0xff]   ;;  %v3458_v41 = vcombine.low %v4981_v7, %v5015_v6  ;;  %v4118_v7 = vld [vmem:[%s5202_s4 + $0x9c] ss:$0 sps:$4 sm:$0xff]  }
 0x232   : > { %3814 = vmatprep.subr.bf16.mxu1 %v4101_v55  ;;  %v2692_v46 = vsel %vm624_vm0, %v4111_v54, 0 }
 0x233   : > { %v5076_v14 = vsel %vm4243_vm3, %v2528_v13, %v2532_v19  ;;  %v3114_v13 = vld [vmem:[%s5161_s9 + $0x30] sm:$0xff] }
 0x234   : > { %v3442_v40 = vcombine.low %v4906_v32, %v5076_v14  ;;  %v3457_v32 = vcombine.low %v4985_v58, %v4993_v9  ;;  %v2874_v58 = vshll.u32 %v1897_v43, 16  ;;  %v3472_v9 = vcombine.low %v5043_v47, %v1897_v43 }
 0x238   : > { %3807 = vmatmul.mubr.msk.bf16.vlgmr.msra.gmra.mrb[0].mxu1 %vm611_vm4, %v4989_v60 }
 0x239   : > { %3815 = vmatpush3.bf16.msra.mxu1 %v4101_v55  ;;  %3810 = vmatprep.mubr.msk.bf16.mxu1 %vm611_vm4, %v5000_v51  ;;  %v3456_v55 = vcombine.low %v4952_v44, %v4975_v0  ;;  %v4114_v44 = vld [vmem:[%s5202_s4 + $0x88] ss:$0 sps:$4 sm:$0xff]   ;;  %v4115_v0 = vld [vmem:[%s5202_s4 + $0x8c] sm:$0xff]  }
 0x23a   : > { %3816 = vmatprep.subr.bf16.mxu1 %v4102_v21  ;;  %v2795_v3 = vsel %vm624_vm0, %v4114_v44, 0 }
 0x23d   : > { %3817 = vmatpush3.bf16.msra.mxu1 %v4102_v21  ;;  %v2911_v21 = vsel %vm624_vm0, %v4118_v7, 0 }
 0x23e   : > { %4038 = vmatprep.subr.msk.bf16.mxu1 %vm624_vm0, %v4103_v23  ;;  %v4120_v23 = vld [vmem:[%s5202_s4 + $0xa8] sm:$0xff]  }
 0x240   : > { %3811 = vmatmul.mubr.msk.bf16.gmra.mrb[4].mxu1 %vm611_vm4, %v5023_v10 }
 0x241   : > { %3820 = vmatprep.mubr.msk.bf16.mxu1 %vm611_vm4, %v3423_v26  ;;  %3819 = vmatpush3.bf16.msra.mxu1 %v2445_v24  ;;  %v2989_v26 = vrot.slane %v1898_v62, 5 }
 0x242   : > { %3828 = vmatprep.subr.bf16.mxu1 %v4104_v25 }
 0x248   : > { %3821 = vmatmul.mubr.msk.bf16.vlgmr.msra.gmra.mrb[0].mxu1 %vm611_vm4, %v3424_v5 }
 0x249   : > { %3829 = vmatpush3.bf16.msra.mxu1 %v4104_v25  ;;  %3824 = vmatprep.mubr.msk.bf16.mxu1 %vm611_vm4, %v3425_v29  ;;  %v3108_v29 = vld [vmem:[%s5161_s9] sm:$0xff] }
 0x24a   : > { %3830 = vmatprep.subr.bf16.mxu1 %v4106_v2 }
 0x24d   : > { %3831 = vmatpush3.bf16.msra.mxu1 %v4106_v2 }
 0x24e   : > { %4039 = vmatprep.subr.msk.bf16.mxu1 %vm624_vm0, %v4108_v59 }
 0x250   : > { %3825 = vmatmul.mubr.msk.bf16.gmra.mrb[4].mxu1 %vm611_vm4, %v3426_v27 }
 0x251   : > { %3834 = vmatprep.mubr.msk.bf16.mxu1 %vm611_vm4, %v3439_v31  ;;  %3833 = vmatpush3.bf16.msra.mxu1 %v2573_v16 }
 0x252   : > { %3842 = vmatprep.subr.bf16.mxu1 %v4109_v30 }
 0x258   : > { %3835 = vmatmul.mubr.msk.bf16.vlgmr.msra.gmra.mrb[0].mxu1 %vm611_vm4, %v3440_v38 }
 0x259   : > { %3843 = vmatpush3.bf16.msra.mxu1 %v4109_v30  ;;  %3838 = vmatprep.mubr.msk.bf16.mxu1 %vm611_vm4, %v3441_v61  ;;  %v3109_v30 = vld [vmem:[%s5161_s9 + $0x8] sm:$0xff] }
 0x25a   : > { %3844 = vmatprep.subr.bf16.mxu1 %v4110_v49 }
 0x25d   : > { %3845 = vmatpush3.bf16.msra.mxu1 %v4110_v49 }
 0x25e   : > { %4040 = vmatprep.subr.msk.bf16.mxu1 %vm624_vm0, %v4111_v54 }
 0x260   : > { %3839 = vmatmul.mubr.msk.bf16.gmra.mrb[4].mxu1 %vm611_vm4, %v3442_v40 }
 0x261   : > { %3848 = vmatprep.mubr.msk.bf16.mxu1 %vm611_vm4, %v3456_v55  ;;  %3847 = vmatpush3.bf16.msra.mxu1 %v2692_v46 }
 0x262   : > { %3856 = vmatprep.subr.bf16.mxu1 %v4112_v28 }
 0x268   : > { %3849 = vmatmul.mubr.msk.bf16.vlgmr.msra.gmra.mrb[0].mxu1 %vm611_vm4, %v3457_v32 }
 0x269   : > { %3857 = vmatpush3.bf16.msra.mxu1 %v4112_v28  ;;  %3852 = vmatprep.mubr.msk.bf16.mxu1 %vm611_vm4, %v3458_v41  ;;  %v3115_v28 = vld [vmem:[%s5161_s9 + $0x38] sm:$0xff]  ;;  %v3113_v41 = vld [vmem:[%s5161_s9 + $0x28] sm:$0xff] }
 0x26a   : > { %3858 = vmatprep.subr.bf16.mxu1 %v4113_v39 }
 0x26d   : > { %3859 = vmatpush3.bf16.msra.mxu1 %v4113_v39 }
 0x26e   : > { %4041 = vmatprep.subr.msk.bf16.mxu1 %vm624_vm0, %v4114_v44 }
 0x270   : > { %3853 = vmatmul.mubr.msk.bf16.gmra.mrb[4].mxu1 %vm611_vm4, %v3459_v63 }
 0x271   : > { %3862 = vmatprep.mubr.msk.bf16.mxu1 %vm611_vm4, %v4928_v34  ;;  %3861 = vmatpush3.bf16.msra.mxu1 %v2795_v3  ;;  %v2871_v34 = vshrl.u32 %v1897_v43, 16 }
 0x272   : > { %3870 = vmatprep.subr.bf16.mxu1 %v4115_v0 }
 0x273   : > { %v2873_v52 = vrot.slane %v2871_v34, 4 }
 0x278   : > { %3863 = vmatmul.mubr.msk.bf16.vlgmr.msra.gmra.mrb[0].mxu1 %vm611_vm4, %v4935_v33  ;;  %v4119_v33 = vld [vmem:[%s5202_s4 + $0xa0] sm:$0xff]  }
 0x279   : > { %3871 = vmatpush3.bf16.msra.mxu1 %v4115_v0  ;;  %3866 = vmatprep.mubr.msk.bf16.mxu1 %vm611_vm4, %v4956_v15  ;;  %v2876_v15 = vrot.slane %v2874_v58, 5 }
 0x27a   : > { %3872 = vmatprep.subr.bf16.mxu1 %v4116_v56 }
 0x27b   : > { %v2877_v4 = vor.u32 %v2876_v15, %v2873_v52 }
 0x27d   : > { %3873 = vmatpush3.bf16.msra.mxu1 %v4116_v56  ;;  %v2878_v6 = vrot.slane %v2877_v4, 4 }
 0x27e   : > { %4042 = vmatprep.subr.msk.bf16.mxu1 %vm624_vm0, %v4118_v7 }
 0x27f   : > { %v2883_v24 = vsel %vm4243_vm3, %v2878_v6, %v2882_v17 }
 0x280   : > { %3867 = vmatmul.mubr.msk.bf16.gmra.mrb[4].mxu1 %vm611_vm4, %v3472_v9  ;;  %v3485_v25 = vcombine.low %v5076_v14, %v2883_v24  ;;  %v3112_v14 = vld [vmem:[%s5161_s9 + $0x20] sm:$0xff] }
 0x281   : > { %3876 = vmatprep.mubr.msk.bf16.mxu1 %vm611_vm4, %v4873_v57  ;;  %3875 = vmatpush3.bf16.msra.mxu1 %v2911_v21  ;;  %v4121_v57 = vld [vmem:[%s5202_s4 + $0xb0] ss:$0 sps:$4 sm:$0xff]  }
 0x282   : > { %3884 = vmatprep.subr.bf16.mxu1 %v4119_v33 }
 0x288   : > { %3877 = vmatmul.mubr.msk.bf16.vlgmr.msra.gmra.mrb[0].mxu1 %vm611_vm4, %v4896_v22  ;;  %v3018_v22 = vsel %vm624_vm0, %v4121_v57, 0 }
 0x289   : > { %3885 = vmatpush3.bf16.msra.mxu1 %v4119_v33  ;;  %3880 = vmatprep.mubr.msk.bf16.mxu1 %vm611_vm4, %v4914_v12  ;;  %v3493_v12 = vrot.slane %v1897_v43, 9 }
 0x28a   : > { %3886 = vmatprep.subr.bf16.mxu1 %v4120_v23 }
 0x28b   : > { %v2990_v35 = vsel %vm4374_vm7, %v3493_v12, %v2989_v26 }
 0x28c   : > { %v3499_v5 = vcombine.low %v2652_v48, %v2990_v35 }
 0x28d   : > { %3887 = vmatpush3.bf16.msra.mxu1 %v4120_v23 }
 0x28e   : > { %4043 = vmatprep.subr.msk.bf16.mxu1 %vm624_vm0, %v4121_v57  ;;  %vm3132_vm0 = vcmask 261120  }
 0x290   : > { %3881 = vmatmul.mubr.msk.bf16.gmra.mrb[4].mxu1 %vm611_vm4, %v3485_v25 }
 0x291   : > { %3890 = vmatprep.mubr.msk.bf16.mxu1 %vm611_vm4, %v4989_v60  ;;  %3889 = vmatpush3.bf16.msra.mxu1 %v3018_v22  ;;  %v3507_v60 = vld [vmem:[%s5203_s5] ss:$0 sm:$0xff] }
 0x298   : > { %3891 = vmatmul.mubr.msk.bf16.vlgmr.msra.gmra.mrb[0].mxu1 %vm611_vm4, %v5000_v51 }
 0x299   : > { %3894 = vmatprep.mubr.msk.bf16.mxu1 %vm611_vm4, %v5023_v10 }
 0x2a0   : > { %3895 = vmatmul.mubr.msk.bf16.gmra.mrb[4].mxu1 %vm611_vm4, %v3499_v5 }
 0x36b   : > { %v3892_v51 = vpop.f32.mrb[0].mxu1 }
 0x36c   : > { %v3102_v10 = vadd.f32 %v3892_v51, %v3507_v60  ;;  %v3054_v2 = vpop.f32.mrb[1].mxu1 }
 0x36d   : > { %v3100_v47 = vadd.f32 %v3507_v60, %v3054_v2  ;;  %v3893_v59 = vpop.f32.mrb[2].mxu1 }
 0x36e   : > { %v3118_v18 = vadd.f32 %v3110_v8, %v3102_v10  ;;  %v3103_v27 = vadd.f32 %v3893_v59, %v3507_v60  ;;  %v3057_v16 = vpop.f32.mrb[3].mxu1 }
 0x36f   : > { %v3116_v31 = vadd.f32 %v3108_v29, %v3100_v47  ;;  %v3101_v53 = vadd.f32 %v3507_v60, %v3057_v16 }
 0x370   : > { %v3126_v36 = vmax.f32 %v3118_v18, 0.0  ;;  %v3119_v11 = vadd.f32 %v3111_v50, %v3103_v27 }
 0x371   : > { %v3124_v1 = vmax.f32 %v3116_v31, 0.0  ;;  %v3117_v37 = vadd.f32 %v3109_v30, %v3101_v53 }
 0x372   : > { %3135 = vst.msk [vmem:[%s5173_s8 + $0x10] sm:$0xff] %vm3132_vm0, %v3126_v36  ;;  %v3127_v38 = vmax.f32 %v3119_v11, 0.0 }
 0x373   : > { %3133 = vst.msk [vmem:[%s5173_s8] sm:$0xff] %vm3132_vm0, %v3124_v1  ;;  %v3125_v49 = vmax.f32 %v3117_v37, 0.0  ;;  %v3896_v61 = vpop.f32.mrb[4].mxu1 }
 0x374   : > { %3136 = vst.msk [vmem:[%s5173_s8 + $0x18] sm:$0xff] %vm3132_vm0, %v3127_v38  ;;  %v3106_v19 = vadd.f32 %v3896_v61, %v3507_v60  ;;  %v3070_v54 = vpop.f32.mrb[5].mxu1 }
 0x375   : > { %3134 = vst.msk [vmem:[%s5173_s8 + $0x8] sm:$0xff] %vm3132_vm0, %v3125_v49  ;;  %v3104_v40 = vadd.f32 %v3507_v60, %v3070_v54  ;;  %v3897_v46 = vpop.f32.mrb[6].mxu1 }
 0x376   : > { %v3122_v55 = vadd.f32 %v3114_v13, %v3106_v19  ;;  %v3107_v32 = vadd.f32 %v3897_v46, %v3507_v60  ;;  %v3073_v39 = vpop.f32.mrb[7].mxu1 }
 0x377   : > { %v3120_v42 = vadd.f32 %v3112_v14, %v3104_v40  ;;  %v3105_v45 = vadd.f32 %v3507_v60, %v3073_v39 }
 0x378   : > { %v3130_v44 = vmax.f32 %v3122_v55, 0.0  ;;  %v3123_v48 = vadd.f32 %v3115_v28, %v3107_v32 }
 0x379   : > { %v3128_v63 = vmax.f32 %v3120_v42, 0.0  ;;  %v3121_v3 = vadd.f32 %v3113_v41, %v3105_v45 }
 0x37a   : > { %3139 = vst.msk [vmem:[%s5173_s8 + $0x30] sm:$0xff] %vm3132_vm0, %v3130_v44  ;;  %v3131_v0 = vmax.f32 %v3123_v48, 0.0 }
 0x37b   : > { %3137 = vst.msk [vmem:[%s5173_s8 + $0x20] sm:$0xff] %vm3132_vm0, %v3128_v63  ;;  %v3129_v56 = vmax.f32 %v3121_v3, 0.0 }
 0x37c   : > { %3140 = vst.msk [vmem:[%s5173_s8 + $0x38] sm:$0xff] %vm3132_vm0, %v3131_v0 }
 0x37d   : > { %3138 = vst.msk [vmem:[%s5173_s8 + $0x28] sm:$0xff] %vm3132_vm0, %v3129_v56 }
 0x37e PF: > { %s16_s21 = sadd.s32 1, %s4128_s21  }
 0x37f   : > { %p13_p4 = scmp.ge.s32.totalorder %s16_s21, 4  }
 0x381   :  { %15 = sbr.rel (!%p13_p4) target bundleno = 1 (0x1), region = 95 }

</bundles_post_ra>
